<compile_context>
chip_gen: v5e
topology: v5e:2x2
jax: 0.10.0
libtpu: 0.0.40
codegen_flags: <defaults>
</compile_context>

<pallas_src>
import functools

import jax
import jax.numpy as jnp
from jax import lax
from jax.experimental import pallas as pl
from jax.experimental.pallas import tpu as pltpu

VMEM = pl.BlockSpec(memory_space=pltpu.MemorySpace.VMEM)
BF16 = jnp.bfloat16
F32 = jnp.float32


def _round_up(x, m):
    return (x + m - 1) // m * m


# ----------------------------------------------------------------------------
# Fused kernel: conv1 (2 steps) -> relu -> conv2 (2 steps) -> relu -> MLP -> edge head
# ----------------------------------------------------------------------------
def _fused_kernel(n_etypes, n_steps,
                  h_ref, A_ref, src_ref, dst_ref,
                  WmT_ref, bm_ref, WihT_ref, WhhT_ref, bih_ref, bhh_ref,
                  W3T_ref, b3_ref, W4T_ref, b4_ref,
                  Wsrc_ref, Wdst_ref, bp_ref,
                  out_ref):
    Np = h_ref.shape[0]
    Ep = out_ref.shape[1]
    A = A_ref[...]                                           # (Np, T*Np) bf16, resident all steps

    def gru(c, a, h):
        # PyTorch nn.GRUCell semantics, gate order (r, z, n); bf16 matmuls, f32 math.
        a_bf = a.astype(BF16)
        h_bf = h.astype(BF16)

        def gate(g):
            gi = jnp.dot(a_bf, WihT_ref[c, g], preferred_element_type=F32) + bih_ref[c, g]
            gh = jnp.dot(h_bf, WhhT_ref[c, g], preferred_element_type=F32) + bhh_ref[c, g]
            return gi, gh

        gi_r, gh_r = gate(0)
        gi_z, gh_z = gate(1)
        gi_n, gh_n = gate(2)
        r = jax.nn.sigmoid(gi_r + gh_r)
        z = jax.nn.sigmoid(gi_z + gh_z)
        n = jnp.tanh(gi_n + r * gh_n)
        return (1.0 - z) * n + z * h

    def ggc_step(c, h):
        # messages m_t = h @ Wm_t^T + bm_t  (T small matmuls), then ONE big aggregation matmul:
        #   a = [A_1 | ... | A_T] @ vstack_t(m_t)
        h_bf = h.astype(BF16)
        msgs = [jnp.dot(h_bf, WmT_ref[c, t], preferred_element_type=F32) + bm_ref[c, t]
                for t in range(n_etypes)]
        m_cat = jnp.concatenate(msgs, axis=0).astype(BF16)    # (T*Np, F)
        a = jnp.dot(A, m_cat, preferred_element_type=F32)     # (Np, F), f32 accumulate
        return gru(c, a, h)

    # --- conv1 / conv2: n_steps propagation steps each, ReLU after each block ---
    h = h_ref[...]                                            # (Np, F) f32
    for c in range(2):
        for _ in range(n_steps):
            h = ggc_step(c, h)
        h = jnp.maximum(h, 0.0)

    # --- MLP head: relu(Linear3(x)); relu(Linear4(x)) ---
    x = jnp.maximum(jnp.dot(h.astype(BF16), W3T_ref[...], preferred_element_type=F32)
                    + b3_ref[...], 0.0)
    x = jnp.maximum(jnp.dot(x.astype(BF16), W4T_ref[...], preferred_element_type=F32)
                    + b4_ref[...], 0.0)                       # (Np, out_feats)

    # --- edge score head:  e_k = sigmoid(Wsrc . x[src_k] + Wdst . x[dst_k] + b) ---
    # Per-node partial scores kept in the lane dimension: (1, Np).
    x_bf = x.astype(BF16)
    t_src = lax.dot_general(Wsrc_ref[...], x_bf, (((1,), (1,)), ((), ())),
                            preferred_element_type=F32)       # (1, Np)
    t_dst = lax.dot_general(Wdst_ref[...], x_bf, (((1,), (1,)), ((), ())),
                            preferred_element_type=F32)       # (1, Np)
    # One-hot selectors built in-kernel from int32 index rows (exact gather, no ExN HBM traffic).
    node_ids = lax.broadcasted_iota(jnp.int32, (Np, Ep), 0)
    SselT = (node_ids == src_ref[...]).astype(F32)            # (Np, Ep)
    DselT = (node_ids == dst_ref[...]).astype(F32)
    logits = (jnp.dot(t_src, SselT, preferred_element_type=F32)
              + jnp.dot(t_dst, DselT, preferred_element_type=F32)
              + bp_ref[...])                                  # (1, Ep) lane-dense
    out_ref[...] = jax.nn.sigmoid(logits)


# ----------------------------------------------------------------------------
# Wrapper: densify graph, pad, launch the single fused kernel
# ----------------------------------------------------------------------------
def gated_graph_model_forward(params, features, src, dst, etypes, n_etypes, n_steps=2):
    N, _ = features.shape
    E = src.shape[0]
    Np = _round_up(N, 8)                      # sublane-aligned node count
    Ep = _round_up(max(E, 1), 128)            # lane-dense edge-score row

    # Concatenated per-etype adjacency: A_cat[v, t*Np + u] = #edges (u -> v) of type t.
    A = jnp.zeros((n_etypes, Np, Np), F32).at[etypes, dst, src].add(1.0)
    A_cat = jnp.transpose(A, (1, 0, 2)).reshape(Np, n_etypes * Np).astype(BF16)

    h0 = jnp.zeros((Np, features.shape[1]), F32).at[:N, :].set(features)
    src_p = jnp.zeros((1, Ep), jnp.int32).at[0, :E].set(src.astype(jnp.int32))
    dst_p = jnp.zeros((1, Ep), jnp.int32).at[0, :E].set(dst.astype(jnp.int32))

    gg, mlp, pred = params["gg"], params["mlp"], params["pred"]
    kernel = functools.partial(_fused_kernel, n_etypes, n_steps)
    out = pl.pallas_call(
        kernel,
        out_shape=jax.ShapeDtypeStruct((1, Ep), F32),
        in_specs=[VMEM] * 17,
        out_specs=VMEM,
        compiler_params=pltpu.CompilerParams(vmem_limit_bytes=64 * 1024 * 1024),
    )(h0, A_cat, src_p, dst_p,
      gg["WmT"].astype(BF16), gg["bm"],
      gg["WihT"].astype(BF16), gg["WhhT"].astype(BF16), gg["bih"], gg["bhh"],
      mlp["W3T"].astype(BF16), mlp["b3"], mlp["W4T"].astype(BF16), mlp["b4"],
      pred["Wsrc"].astype(BF16), pred["Wdst"].astype(BF16), pred["b"])
    return out[0, :E]


# ----------------------------------------------------------------------------
# Pure-JAX f32 reference (same math) — correctness check only
# ----------------------------------------------------------------------------
def reference_forward(params, features, src, dst, etypes, n_etypes, n_steps=2):
    N, _ = features.shape
    gg, mlp, pred = params["gg"], params["mlp"], params["pred"]
    A = jnp.zeros((n_etypes, N, N), F32).at[etypes, dst, src].add(1.0)

    def ggc_step(c, h):
        a = jnp.zeros_like(h)
        for t in range(n_etypes):
            a = a + A[t] @ (h @ gg["WmT"][c, t] + gg["bm"][c, t])
        gi = [a @ gg["WihT"][c, g] + gg["bih"][c, g] for g in range(3)]
        gh = [h @ gg["WhhT"][c, g] + gg["bhh"][c, g] for g in range(3)]
        r = jax.nn.sigmoid(gi[0] + gh[0])
        z = jax.nn.sigmoid(gi[1] + gh[1])
        n = jnp.tanh(gi[2] + r * gh[2])
        return (1.0 - z) * n + z * h

    h = features
    for c in range(2):
        for _ in range(n_steps):
            h = ggc_step(c, h)
        h = jnp.maximum(h, 0.0)
    x = jnp.maximum(h @ mlp["W3T"] + mlp["b3"], 0.0)
    x = jnp.maximum(x @ mlp["W4T"] + mlp["b4"], 0.0)
    logits = x[src] @ pred["Wsrc"][0] + x[dst] @ pred["Wdst"][0] + pred["b"][0, 0]
    return jax.nn.sigmoid(logits)


# ----------------------------------------------------------------------------
# Deterministic parameter init (shapes follow the PyTorch module, pre-transposed)
# ----------------------------------------------------------------------------
def init_params(key, in_feats, hidden_size, out_feats, n_etypes):
    F = in_feats

    def lin_t(k, in_dim, out_dim):
        # nn.Linear init, returned pre-transposed: W^T (in_dim, out_dim), b (1, out_dim)
        bound = 1.0 / jnp.sqrt(jnp.float32(in_dim))
        kw, kb = jax.random.split(k)
        WT = jax.random.uniform(kw, (in_dim, out_dim), F32, -bound, bound)
        b = jax.random.uniform(kb, (1, out_dim), F32, -bound, bound)
        return WT, b

    def ggc(k):
        ks = jax.random.split(k, n_etypes + 6)
        msg = [lin_t(ks[t], F, F) for t in range(n_etypes)]
        ih = [lin_t(ks[n_etypes + g], F, F) for g in range(3)]        # GRU gate order r, z, n
        hh = [lin_t(ks[n_etypes + 3 + g], F, F) for g in range(3)]
        return dict(WmT=jnp.stack([w for w, _ in msg]), bm=jnp.stack([b for _, b in msg]),
                    WihT=jnp.stack([w for w, _ in ih]), bih=jnp.stack([b for _, b in ih]),
                    WhhT=jnp.stack([w for w, _ in hh]), bhh=jnp.stack([b for _, b in hh]))

    k1, k2, k3, k4, k5 = jax.random.split(key, 5)
    g1, g2 = ggc(k1), ggc(k2)
    gg = {name: jnp.stack([g1[name], g2[name]]) for name in g1}       # leading dim = conv block

    W3T, b3 = lin_t(k3, in_feats, hidden_size)
    W4T, b4 = lin_t(k4, hidden_size, out_feats)
    # NOTE: the PyTorch spec declares pred = nn.Linear(out_feats, 1) but feeds it the
    # 2*out_feats concatenation; we implement the working Linear(2*out_feats, 1) split as
    # [Wsrc | Wdst] (same interpretation as the previously accepted version).
    WpT, bp = lin_t(k5, 2 * out_feats, 1)
    return dict(
        gg=gg,
        mlp=dict(W3T=W3T, b3=b3, W4T=W4T, b4=b4),
        pred=dict(Wsrc=WpT[:out_feats, :].T, Wdst=WpT[out_feats:, :].T, b=bp),
    )


if __name__ == "__main__":
    # Small deterministic problem
    N, E, n_etypes = 16, 24, 3
    in_feats, hidden_size, out_feats = 32, 64, 32

    key = jax.random.PRNGKey(0)
    kg, kp = jax.random.split(key)
    k1, k2, k3, k4 = jax.random.split(kg, 4)

    src = jax.random.randint(k1, (E,), 0, N, dtype=jnp.int32)
    dst = jax.random.randint(k2, (E,), 0, N, dtype=jnp.int32)
    etypes = jax.random.randint(k3, (E,), 0, n_etypes, dtype=jnp.int32)
    features = jax.random.normal(k4, (N, in_feats), F32)

    params = init_params(kp, in_feats, hidden_size, out_feats, n_etypes)

    fwd = jax.jit(functools.partial(gated_graph_model_forward, n_etypes=n_etypes))
    out = jax.block_until_ready(fwd(params, features, src, dst, etypes))

    ref = jax.block_until_ready(
        reference_forward(params, features, src, dst, etypes, n_etypes))

    assert out.shape == (E,), out.shape
    # Tolerance loosened vs. the f32 reference because kernel matmul operands are bf16
    # (accumulation stays f32), as recommended in the perf review.
    assert jnp.allclose(out, ref, atol=3e-2, rtol=3e-2), (
        "mismatch vs JAX reference, max|diff|=%s" % jnp.max(jnp.abs(out - ref)))

    print("KERNEL_OK")
</pallas_src>

<mosaic_0001>
module attributes {stable_mosaic.version = 11 : i64} {
  func.func @_fused_kernel(%arg0: memref<16x32xf32, #tpu.memory_space<vmem>>, %arg1: memref<16x48xbf16, #tpu.memory_space<vmem>>, %arg2: memref<1x128xi32, #tpu.memory_space<vmem>>, %arg3: memref<1x128xi32, #tpu.memory_space<vmem>>, %arg4: memref<2x3x32x32xbf16, #tpu.memory_space<vmem>>, %arg5: memref<2x3x1x32xf32, #tpu.memory_space<vmem>>, %arg6: memref<2x3x32x32xbf16, #tpu.memory_space<vmem>>, %arg7: memref<2x3x32x32xbf16, #tpu.memory_space<vmem>>, %arg8: memref<2x3x1x32xf32, #tpu.memory_space<vmem>>, %arg9: memref<2x3x1x32xf32, #tpu.memory_space<vmem>>, %arg10: memref<32x64xbf16, #tpu.memory_space<vmem>>, %arg11: memref<1x64xf32, #tpu.memory_space<vmem>>, %arg12: memref<64x32xbf16, #tpu.memory_space<vmem>>, %arg13: memref<1x32xf32, #tpu.memory_space<vmem>>, %arg14: memref<1x32xbf16, #tpu.memory_space<vmem>>, %arg15: memref<1x32xbf16, #tpu.memory_space<vmem>>, %arg16: memref<1x1xf32, #tpu.memory_space<vmem>>, %arg17: memref<1x128xf32, #tpu.memory_space<vmem>>) attributes {dimension_semantics = [], scalar_prefetch = 0 : i64, scratch_operands = 0 : i64, tpu.core_type = #tpu.core_type<tc>} {
    %c0 = arith.constant 0 : index
    %c0_0 = arith.constant 0 : index
    %0 = vector.load %arg1[%c0, %c0_0] : memref<16x48xbf16, #tpu.memory_space<vmem>>, vector<16x48xbf16>
    %c0_1 = arith.constant 0 : index
    %c0_2 = arith.constant 0 : index
    %1 = vector.load %arg0[%c0_1, %c0_2] : memref<16x32xf32, #tpu.memory_space<vmem>>, vector<16x32xf32>
    %2 = arith.truncf %1 : vector<16x32xf32> to vector<16x32xbf16>
    %c0_3 = arith.constant 0 : index
    %c0_4 = arith.constant 0 : index
    %c0_5 = arith.constant 0 : index
    %c0_6 = arith.constant 0 : index
    %3 = vector.load %arg4[%c0_3, %c0_4, %c0_5, %c0_6] : memref<2x3x32x32xbf16, #tpu.memory_space<vmem>>, vector<1x1x32x32xbf16>
    %4 = vector.shape_cast %3 : vector<1x1x32x32xbf16> to vector<32x32xbf16>
    %cst = arith.constant dense<0.000000e+00> : vector<16x32xf32>
    %5 = tpu.matmul %2, %4, %cst {dimension_numbers = #tpu.dot_dimension_numbers<[1], [0], [0], [1], [0, 0, 1, 1], [], []>} : vector<16x32xbf16>, vector<32x32xbf16>, vector<16x32xf32> -> vector<16x32xf32>
    %c0_7 = arith.constant 0 : index
    %c0_8 = arith.constant 0 : index
    %c0_9 = arith.constant 0 : index
    %c0_10 = arith.constant 0 : index
    %6 = vector.load %arg5[%c0_7, %c0_8, %c0_9, %c0_10] : memref<2x3x1x32xf32, #tpu.memory_space<vmem>>, vector<1x1x1x32xf32>
    %7 = vector.shape_cast %6 : vector<1x1x1x32xf32> to vector<1x32xf32>
    %8 = vector.broadcast %7 : vector<1x32xf32> to vector<16x32xf32>
    %9 = arith.addf %5, %8 : vector<16x32xf32>
    %c0_11 = arith.constant 0 : index
    %c1 = arith.constant 1 : index
    %c0_12 = arith.constant 0 : index
    %c0_13 = arith.constant 0 : index
    %10 = vector.load %arg4[%c0_11, %c1, %c0_12, %c0_13] : memref<2x3x32x32xbf16, #tpu.memory_space<vmem>>, vector<1x1x32x32xbf16>
    %11 = vector.shape_cast %10 : vector<1x1x32x32xbf16> to vector<32x32xbf16>
    %cst_14 = arith.constant dense<0.000000e+00> : vector<16x32xf32>
    %12 = tpu.matmul %2, %11, %cst_14 {dimension_numbers = #tpu.dot_dimension_numbers<[1], [0], [0], [1], [0, 0, 1, 1], [], []>} : vector<16x32xbf16>, vector<32x32xbf16>, vector<16x32xf32> -> vector<16x32xf32>
    %c0_15 = arith.constant 0 : index
    %c1_16 = arith.constant 1 : index
    %c0_17 = arith.constant 0 : index
    %c0_18 = arith.constant 0 : index
    %13 = vector.load %arg5[%c0_15, %c1_16, %c0_17, %c0_18] : memref<2x3x1x32xf32, #tpu.memory_space<vmem>>, vector<1x1x1x32xf32>
    %14 = vector.shape_cast %13 : vector<1x1x1x32xf32> to vector<1x32xf32>
    %15 = vector.broadcast %14 : vector<1x32xf32> to vector<16x32xf32>
    %16 = arith.addf %12, %15 : vector<16x32xf32>
    %c0_19 = arith.constant 0 : index
    %c2 = arith.constant 2 : index
    %c0_20 = arith.constant 0 : index
    %c0_21 = arith.constant 0 : index
    %17 = vector.load %arg4[%c0_19, %c2, %c0_20, %c0_21] : memref<2x3x32x32xbf16, #tpu.memory_space<vmem>>, vector<1x1x32x32xbf16>
    %18 = vector.shape_cast %17 : vector<1x1x32x32xbf16> to vector<32x32xbf16>
    %cst_22 = arith.constant dense<0.000000e+00> : vector<16x32xf32>
    %19 = tpu.matmul %2, %18, %cst_22 {dimension_numbers = #tpu.dot_dimension_numbers<[1], [0], [0], [1], [0, 0, 1, 1], [], []>} : vector<16x32xbf16>, vector<32x32xbf16>, vector<16x32xf32> -> vector<16x32xf32>
    %c0_23 = arith.constant 0 : index
    %c2_24 = arith.constant 2 : index
    %c0_25 = arith.constant 0 : index
    %c0_26 = arith.constant 0 : index
    %20 = vector.load %arg5[%c0_23, %c2_24, %c0_25, %c0_26] : memref<2x3x1x32xf32, #tpu.memory_space<vmem>>, vector<1x1x1x32xf32>
    %21 = vector.shape_cast %20 : vector<1x1x1x32xf32> to vector<1x32xf32>
    %22 = vector.broadcast %21 : vector<1x32xf32> to vector<16x32xf32>
    %23 = arith.addf %19, %22 : vector<16x32xf32>
    %24 = tpu.concatenate %9, %16, %23 in 0 : vector<16x32xf32>, vector<16x32xf32>, vector<16x32xf32> -> vector<48x32xf32>
    %25 = arith.truncf %24 : vector<48x32xf32> to vector<48x32xbf16>
    %cst_27 = arith.constant dense<0.000000e+00> : vector<16x32xf32>
    %26 = tpu.matmul %0, %25, %cst_27 {dimension_numbers = #tpu.dot_dimension_numbers<[1], [0], [0], [1], [0, 0, 1, 1], [], []>} : vector<16x48xbf16>, vector<48x32xbf16>, vector<16x32xf32> -> vector<16x32xf32>
    %27 = arith.truncf %26 : vector<16x32xf32> to vector<16x32xbf16>
    %28 = arith.truncf %1 : vector<16x32xf32> to vector<16x32xbf16>
    %c0_28 = arith.constant 0 : index
    %c0_29 = arith.constant 0 : index
    %c0_30 = arith.constant 0 : index
    %c0_31 = arith.constant 0 : index
    %29 = vector.load %arg6[%c0_28, %c0_29, %c0_30, %c0_31] : memref<2x3x32x32xbf16, #tpu.memory_space<vmem>>, vector<1x1x32x32xbf16>
    %30 = vector.shape_cast %29 : vector<1x1x32x32xbf16> to vector<32x32xbf16>
    %cst_32 = arith.constant dense<0.000000e+00> : vector<16x32xf32>
    %31 = tpu.matmul %27, %30, %cst_32 {dimension_numbers = #tpu.dot_dimension_numbers<[1], [0], [0], [1], [0, 0, 1, 1], [], []>} : vector<16x32xbf16>, vector<32x32xbf16>, vector<16x32xf32> -> vector<16x32xf32>
    %c0_33 = arith.constant 0 : index
    %c0_34 = arith.constant 0 : index
    %c0_35 = arith.constant 0 : index
    %c0_36 = arith.constant 0 : index
    %32 = vector.load %arg8[%c0_33, %c0_34, %c0_35, %c0_36] : memref<2x3x1x32xf32, #tpu.memory_space<vmem>>, vector<1x1x1x32xf32>
    %33 = vector.shape_cast %32 : vector<1x1x1x32xf32> to vector<1x32xf32>
    %34 = vector.broadcast %33 : vector<1x32xf32> to vector<16x32xf32>
    %35 = arith.addf %31, %34 : vector<16x32xf32>
    %c0_37 = arith.constant 0 : index
    %c0_38 = arith.constant 0 : index
    %c0_39 = arith.constant 0 : index
    %c0_40 = arith.constant 0 : index
    %36 = vector.load %arg7[%c0_37, %c0_38, %c0_39, %c0_40] : memref<2x3x32x32xbf16, #tpu.memory_space<vmem>>, vector<1x1x32x32xbf16>
    %37 = vector.shape_cast %36 : vector<1x1x32x32xbf16> to vector<32x32xbf16>
    %cst_41 = arith.constant dense<0.000000e+00> : vector<16x32xf32>
    %38 = tpu.matmul %28, %37, %cst_41 {dimension_numbers = #tpu.dot_dimension_numbers<[1], [0], [0], [1], [0, 0, 1, 1], [], []>} : vector<16x32xbf16>, vector<32x32xbf16>, vector<16x32xf32> -> vector<16x32xf32>
    %c0_42 = arith.constant 0 : index
    %c0_43 = arith.constant 0 : index
    %c0_44 = arith.constant 0 : index
    %c0_45 = arith.constant 0 : index
    %39 = vector.load %arg9[%c0_42, %c0_43, %c0_44, %c0_45] : memref<2x3x1x32xf32, #tpu.memory_space<vmem>>, vector<1x1x1x32xf32>
    %40 = vector.shape_cast %39 : vector<1x1x1x32xf32> to vector<1x32xf32>
    %41 = vector.broadcast %40 : vector<1x32xf32> to vector<16x32xf32>
    %42 = arith.addf %38, %41 : vector<16x32xf32>
    %c0_46 = arith.constant 0 : index
    %c1_47 = arith.constant 1 : index
    %c0_48 = arith.constant 0 : index
    %c0_49 = arith.constant 0 : index
    %43 = vector.load %arg6[%c0_46, %c1_47, %c0_48, %c0_49] : memref<2x3x32x32xbf16, #tpu.memory_space<vmem>>, vector<1x1x32x32xbf16>
    %44 = vector.shape_cast %43 : vector<1x1x32x32xbf16> to vector<32x32xbf16>
    %cst_50 = arith.constant dense<0.000000e+00> : vector<16x32xf32>
    %45 = tpu.matmul %27, %44, %cst_50 {dimension_numbers = #tpu.dot_dimension_numbers<[1], [0], [0], [1], [0, 0, 1, 1], [], []>} : vector<16x32xbf16>, vector<32x32xbf16>, vector<16x32xf32> -> vector<16x32xf32>
    %c0_51 = arith.constant 0 : index
    %c1_52 = arith.constant 1 : index
    %c0_53 = arith.constant 0 : index
    %c0_54 = arith.constant 0 : index
    %46 = vector.load %arg8[%c0_51, %c1_52, %c0_53, %c0_54] : memref<2x3x1x32xf32, #tpu.memory_space<vmem>>, vector<1x1x1x32xf32>
    %47 = vector.shape_cast %46 : vector<1x1x1x32xf32> to vector<1x32xf32>
    %48 = vector.broadcast %47 : vector<1x32xf32> to vector<16x32xf32>
    %49 = arith.addf %45, %48 : vector<16x32xf32>
    %c0_55 = arith.constant 0 : index
    %c1_56 = arith.constant 1 : index
    %c0_57 = arith.constant 0 : index
    %c0_58 = arith.constant 0 : index
    %50 = vector.load %arg7[%c0_55, %c1_56, %c0_57, %c0_58] : memref<2x3x32x32xbf16, #tpu.memory_space<vmem>>, vector<1x1x32x32xbf16>
    %51 = vector.shape_cast %50 : vector<1x1x32x32xbf16> to vector<32x32xbf16>
    %cst_59 = arith.constant dense<0.000000e+00> : vector<16x32xf32>
    %52 = tpu.matmul %28, %51, %cst_59 {dimension_numbers = #tpu.dot_dimension_numbers<[1], [0], [0], [1], [0, 0, 1, 1], [], []>} : vector<16x32xbf16>, vector<32x32xbf16>, vector<16x32xf32> -> vector<16x32xf32>
    %c0_60 = arith.constant 0 : index
    %c1_61 = arith.constant 1 : index
    %c0_62 = arith.constant 0 : index
    %c0_63 = arith.constant 0 : index
    %53 = vector.load %arg9[%c0_60, %c1_61, %c0_62, %c0_63] : memref<2x3x1x32xf32, #tpu.memory_space<vmem>>, vector<1x1x1x32xf32>
    %54 = vector.shape_cast %53 : vector<1x1x1x32xf32> to vector<1x32xf32>
    %55 = vector.broadcast %54 : vector<1x32xf32> to vector<16x32xf32>
    %56 = arith.addf %52, %55 : vector<16x32xf32>
    %c0_64 = arith.constant 0 : index
    %c2_65 = arith.constant 2 : index
    %c0_66 = arith.constant 0 : index
    %c0_67 = arith.constant 0 : index
    %57 = vector.load %arg6[%c0_64, %c2_65, %c0_66, %c0_67] : memref<2x3x32x32xbf16, #tpu.memory_space<vmem>>, vector<1x1x32x32xbf16>
    %58 = vector.shape_cast %57 : vector<1x1x32x32xbf16> to vector<32x32xbf16>
    %cst_68 = arith.constant dense<0.000000e+00> : vector<16x32xf32>
    %59 = tpu.matmul %27, %58, %cst_68 {dimension_numbers = #tpu.dot_dimension_numbers<[1], [0], [0], [1], [0, 0, 1, 1], [], []>} : vector<16x32xbf16>, vector<32x32xbf16>, vector<16x32xf32> -> vector<16x32xf32>
    %c0_69 = arith.constant 0 : index
    %c2_70 = arith.constant 2 : index
    %c0_71 = arith.constant 0 : index
    %c0_72 = arith.constant 0 : index
    %60 = vector.load %arg8[%c0_69, %c2_70, %c0_71, %c0_72] : memref<2x3x1x32xf32, #tpu.memory_space<vmem>>, vector<1x1x1x32xf32>
    %61 = vector.shape_cast %60 : vector<1x1x1x32xf32> to vector<1x32xf32>
    %62 = vector.broadcast %61 : vector<1x32xf32> to vector<16x32xf32>
    %63 = arith.addf %59, %62 : vector<16x32xf32>
    %c0_73 = arith.constant 0 : index
    %c2_74 = arith.constant 2 : index
    %c0_75 = arith.constant 0 : index
    %c0_76 = arith.constant 0 : index
    %64 = vector.load %arg7[%c0_73, %c2_74, %c0_75, %c0_76] : memref<2x3x32x32xbf16, #tpu.memory_space<vmem>>, vector<1x1x32x32xbf16>
    %65 = vector.shape_cast %64 : vector<1x1x32x32xbf16> to vector<32x32xbf16>
    %cst_77 = arith.constant dense<0.000000e+00> : vector<16x32xf32>
    %66 = tpu.matmul %28, %65, %cst_77 {dimension_numbers = #tpu.dot_dimension_numbers<[1], [0], [0], [1], [0, 0, 1, 1], [], []>} : vector<16x32xbf16>, vector<32x32xbf16>, vector<16x32xf32> -> vector<16x32xf32>
    %c0_78 = arith.constant 0 : index
    %c2_79 = arith.constant 2 : index
    %c0_80 = arith.constant 0 : index
    %c0_81 = arith.constant 0 : index
    %67 = vector.load %arg9[%c0_78, %c2_79, %c0_80, %c0_81] : memref<2x3x1x32xf32, #tpu.memory_space<vmem>>, vector<1x1x1x32xf32>
    %68 = vector.shape_cast %67 : vector<1x1x1x32xf32> to vector<1x32xf32>
    %69 = vector.broadcast %68 : vector<1x32xf32> to vector<16x32xf32>
    %70 = arith.addf %66, %69 : vector<16x32xf32>
    %71 = arith.addf %35, %42 : vector<16x32xf32>
    %72 = arith.negf %71 : vector<16x32xf32>
    %73 = math.exp %72 : vector<16x32xf32>
    %cst_82 = arith.constant 1.000000e+00 : f32
    %74 = vector.broadcast %cst_82 : f32 to vector<16x32xf32>
    %75 = arith.addf %74, %73 : vector<16x32xf32>
    %76 = arith.divf %74, %75 : vector<16x32xf32>
    %77 = arith.addf %49, %56 : vector<16x32xf32>
    %78 = arith.negf %77 : vector<16x32xf32>
    %79 = math.exp %78 : vector<16x32xf32>
    %cst_83 = arith.constant 1.000000e+00 : f32
    %80 = vector.broadcast %cst_83 : f32 to vector<16x32xf32>
    %81 = arith.addf %80, %79 : vector<16x32xf32>
    %82 = arith.divf %80, %81 : vector<16x32xf32>
    %83 = arith.mulf %76, %70 : vector<16x32xf32>
    %84 = arith.addf %63, %83 : vector<16x32xf32>
    %85 = math.tanh %84 : vector<16x32xf32>
    %cst_84 = arith.constant 1.000000e+00 : f32
    %86 = vector.broadcast %cst_84 : f32 to vector<16x32xf32>
    %87 = arith.subf %86, %82 : vector<16x32xf32>
    %88 = arith.mulf %87, %85 : vector<16x32xf32>
    %89 = arith.mulf %82, %1 : vector<16x32xf32>
    %90 = arith.addf %88, %89 : vector<16x32xf32>
    %91 = arith.truncf %90 : vector<16x32xf32> to vector<16x32xbf16>
    %c0_85 = arith.constant 0 : index
    %c0_86 = arith.constant 0 : index
    %c0_87 = arith.constant 0 : index
    %c0_88 = arith.constant 0 : index
    %92 = vector.load %arg4[%c0_85, %c0_86, %c0_87, %c0_88] : memref<2x3x32x32xbf16, #tpu.memory_space<vmem>>, vector<1x1x32x32xbf16>
    %93 = vector.shape_cast %92 : vector<1x1x32x32xbf16> to vector<32x32xbf16>
    %cst_89 = arith.constant dense<0.000000e+00> : vector<16x32xf32>
    %94 = tpu.matmul %91, %93, %cst_89 {dimension_numbers = #tpu.dot_dimension_numbers<[1], [0], [0], [1], [0, 0, 1, 1], [], []>} : vector<16x32xbf16>, vector<32x32xbf16>, vector<16x32xf32> -> vector<16x32xf32>
    %c0_90 = arith.constant 0 : index
    %c0_91 = arith.constant 0 : index
    %c0_92 = arith.constant 0 : index
    %c0_93 = arith.constant 0 : index
    %95 = vector.load %arg5[%c0_90, %c0_91, %c0_92, %c0_93] : memref<2x3x1x32xf32, #tpu.memory_space<vmem>>, vector<1x1x1x32xf32>
    %96 = vector.shape_cast %95 : vector<1x1x1x32xf32> to vector<1x32xf32>
    %97 = vector.broadcast %96 : vector<1x32xf32> to vector<16x32xf32>
    %98 = arith.addf %94, %97 : vector<16x32xf32>
    %c0_94 = arith.constant 0 : index
    %c1_95 = arith.constant 1 : index
    %c0_96 = arith.constant 0 : index
    %c0_97 = arith.constant 0 : index
    %99 = vector.load %arg4[%c0_94, %c1_95, %c0_96, %c0_97] : memref<2x3x32x32xbf16, #tpu.memory_space<vmem>>, vector<1x1x32x32xbf16>
    %100 = vector.shape_cast %99 : vector<1x1x32x32xbf16> to vector<32x32xbf16>
    %cst_98 = arith.constant dense<0.000000e+00> : vector<16x32xf32>
    %101 = tpu.matmul %91, %100, %cst_98 {dimension_numbers = #tpu.dot_dimension_numbers<[1], [0], [0], [1], [0, 0, 1, 1], [], []>} : vector<16x32xbf16>, vector<32x32xbf16>, vector<16x32xf32> -> vector<16x32xf32>
    %c0_99 = arith.constant 0 : index
    %c1_100 = arith.constant 1 : index
    %c0_101 = arith.constant 0 : index
    %c0_102 = arith.constant 0 : index
    %102 = vector.load %arg5[%c0_99, %c1_100, %c0_101, %c0_102] : memref<2x3x1x32xf32, #tpu.memory_space<vmem>>, vector<1x1x1x32xf32>
    %103 = vector.shape_cast %102 : vector<1x1x1x32xf32> to vector<1x32xf32>
    %104 = vector.broadcast %103 : vector<1x32xf32> to vector<16x32xf32>
    %105 = arith.addf %101, %104 : vector<16x32xf32>
    %c0_103 = arith.constant 0 : index
    %c2_104 = arith.constant 2 : index
    %c0_105 = arith.constant 0 : index
    %c0_106 = arith.constant 0 : index
    %106 = vector.load %arg4[%c0_103, %c2_104, %c0_105, %c0_106] : memref<2x3x32x32xbf16, #tpu.memory_space<vmem>>, vector<1x1x32x32xbf16>
    %107 = vector.shape_cast %106 : vector<1x1x32x32xbf16> to vector<32x32xbf16>
    %cst_107 = arith.constant dense<0.000000e+00> : vector<16x32xf32>
    %108 = tpu.matmul %91, %107, %cst_107 {dimension_numbers = #tpu.dot_dimension_numbers<[1], [0], [0], [1], [0, 0, 1, 1], [], []>} : vector<16x32xbf16>, vector<32x32xbf16>, vector<16x32xf32> -> vector<16x32xf32>
    %c0_108 = arith.constant 0 : index
    %c2_109 = arith.constant 2 : index
    %c0_110 = arith.constant 0 : index
    %c0_111 = arith.constant 0 : index
    %109 = vector.load %arg5[%c0_108, %c2_109, %c0_110, %c0_111] : memref<2x3x1x32xf32, #tpu.memory_space<vmem>>, vector<1x1x1x32xf32>
    %110 = vector.shape_cast %109 : vector<1x1x1x32xf32> to vector<1x32xf32>
    %111 = vector.broadcast %110 : vector<1x32xf32> to vector<16x32xf32>
    %112 = arith.addf %108, %111 : vector<16x32xf32>
    %113 = tpu.concatenate %98, %105, %112 in 0 : vector<16x32xf32>, vector<16x32xf32>, vector<16x32xf32> -> vector<48x32xf32>
    %114 = arith.truncf %113 : vector<48x32xf32> to vector<48x32xbf16>
    %cst_112 = arith.constant dense<0.000000e+00> : vector<16x32xf32>
    %115 = tpu.matmul %0, %114, %cst_112 {dimension_numbers = #tpu.dot_dimension_numbers<[1], [0], [0], [1], [0, 0, 1, 1], [], []>} : vector<16x48xbf16>, vector<48x32xbf16>, vector<16x32xf32> -> vector<16x32xf32>
    %116 = arith.truncf %115 : vector<16x32xf32> to vector<16x32xbf16>
    %117 = arith.truncf %90 : vector<16x32xf32> to vector<16x32xbf16>
    %c0_113 = arith.constant 0 : index
    %c0_114 = arith.constant 0 : index
    %c0_115 = arith.constant 0 : index
    %c0_116 = arith.constant 0 : index
    %118 = vector.load %arg6[%c0_113, %c0_114, %c0_115, %c0_116] : memref<2x3x32x32xbf16, #tpu.memory_space<vmem>>, vector<1x1x32x32xbf16>
    %119 = vector.shape_cast %118 : vector<1x1x32x32xbf16> to vector<32x32xbf16>
    %cst_117 = arith.constant dense<0.000000e+00> : vector<16x32xf32>
    %120 = tpu.matmul %116, %119, %cst_117 {dimension_numbers = #tpu.dot_dimension_numbers<[1], [0], [0], [1], [0, 0, 1, 1], [], []>} : vector<16x32xbf16>, vector<32x32xbf16>, vector<16x32xf32> -> vector<16x32xf32>
    %c0_118 = arith.constant 0 : index
    %c0_119 = arith.constant 0 : index
    %c0_120 = arith.constant 0 : index
    %c0_121 = arith.constant 0 : index
    %121 = vector.load %arg8[%c0_118, %c0_119, %c0_120, %c0_121] : memref<2x3x1x32xf32, #tpu.memory_space<vmem>>, vector<1x1x1x32xf32>
    %122 = vector.shape_cast %121 : vector<1x1x1x32xf32> to vector<1x32xf32>
    %123 = vector.broadcast %122 : vector<1x32xf32> to vector<16x32xf32>
    %124 = arith.addf %120, %123 : vector<16x32xf32>
    %c0_122 = arith.constant 0 : index
    %c0_123 = arith.constant 0 : index
    %c0_124 = arith.constant 0 : index
    %c0_125 = arith.constant 0 : index
    %125 = vector.load %arg7[%c0_122, %c0_123, %c0_124, %c0_125] : memref<2x3x32x32xbf16, #tpu.memory_space<vmem>>, vector<1x1x32x32xbf16>
    %126 = vector.shape_cast %125 : vector<1x1x32x32xbf16> to vector<32x32xbf16>
    %cst_126 = arith.constant dense<0.000000e+00> : vector<16x32xf32>
    %127 = tpu.matmul %117, %126, %cst_126 {dimension_numbers = #tpu.dot_dimension_numbers<[1], [0], [0], [1], [0, 0, 1, 1], [], []>} : vector<16x32xbf16>, vector<32x32xbf16>, vector<16x32xf32> -> vector<16x32xf32>
    %c0_127 = arith.constant 0 : index
    %c0_128 = arith.constant 0 : index
    %c0_129 = arith.constant 0 : index
    %c0_130 = arith.constant 0 : index
    %128 = vector.load %arg9[%c0_127, %c0_128, %c0_129, %c0_130] : memref<2x3x1x32xf32, #tpu.memory_space<vmem>>, vector<1x1x1x32xf32>
    %129 = vector.shape_cast %128 : vector<1x1x1x32xf32> to vector<1x32xf32>
    %130 = vector.broadcast %129 : vector<1x32xf32> to vector<16x32xf32>
    %131 = arith.addf %127, %130 : vector<16x32xf32>
    %c0_131 = arith.constant 0 : index
    %c1_132 = arith.constant 1 : index
    %c0_133 = arith.constant 0 : index
    %c0_134 = arith.constant 0 : index
    %132 = vector.load %arg6[%c0_131, %c1_132, %c0_133, %c0_134] : memref<2x3x32x32xbf16, #tpu.memory_space<vmem>>, vector<1x1x32x32xbf16>
    %133 = vector.shape_cast %132 : vector<1x1x32x32xbf16> to vector<32x32xbf16>
    %cst_135 = arith.constant dense<0.000000e+00> : vector<16x32xf32>
    %134 = tpu.matmul %116, %133, %cst_135 {dimension_numbers = #tpu.dot_dimension_numbers<[1], [0], [0], [1], [0, 0, 1, 1], [], []>} : vector<16x32xbf16>, vector<32x32xbf16>, vector<16x32xf32> -> vector<16x32xf32>
    %c0_136 = arith.constant 0 : index
    %c1_137 = arith.constant 1 : index
    %c0_138 = arith.constant 0 : index
    %c0_139 = arith.constant 0 : index
    %135 = vector.load %arg8[%c0_136, %c1_137, %c0_138, %c0_139] : memref<2x3x1x32xf32, #tpu.memory_space<vmem>>, vector<1x1x1x32xf32>
    %136 = vector.shape_cast %135 : vector<1x1x1x32xf32> to vector<1x32xf32>
    %137 = vector.broadcast %136 : vector<1x32xf32> to vector<16x32xf32>
    %138 = arith.addf %134, %137 : vector<16x32xf32>
    %c0_140 = arith.constant 0 : index
    %c1_141 = arith.constant 1 : index
    %c0_142 = arith.constant 0 : index
    %c0_143 = arith.constant 0 : index
    %139 = vector.load %arg7[%c0_140, %c1_141, %c0_142, %c0_143] : memref<2x3x32x32xbf16, #tpu.memory_space<vmem>>, vector<1x1x32x32xbf16>
    %140 = vector.shape_cast %139 : vector<1x1x32x32xbf16> to vector<32x32xbf16>
    %cst_144 = arith.constant dense<0.000000e+00> : vector<16x32xf32>
    %141 = tpu.matmul %117, %140, %cst_144 {dimension_numbers = #tpu.dot_dimension_numbers<[1], [0], [0], [1], [0, 0, 1, 1], [], []>} : vector<16x32xbf16>, vector<32x32xbf16>, vector<16x32xf32> -> vector<16x32xf32>
    %c0_145 = arith.constant 0 : index
    %c1_146 = arith.constant 1 : index
    %c0_147 = arith.constant 0 : index
    %c0_148 = arith.constant 0 : index
    %142 = vector.load %arg9[%c0_145, %c1_146, %c0_147, %c0_148] : memref<2x3x1x32xf32, #tpu.memory_space<vmem>>, vector<1x1x1x32xf32>
    %143 = vector.shape_cast %142 : vector<1x1x1x32xf32> to vector<1x32xf32>
    %144 = vector.broadcast %143 : vector<1x32xf32> to vector<16x32xf32>
    %145 = arith.addf %141, %144 : vector<16x32xf32>
    %c0_149 = arith.constant 0 : index
    %c2_150 = arith.constant 2 : index
    %c0_151 = arith.constant 0 : index
    %c0_152 = arith.constant 0 : index
    %146 = vector.load %arg6[%c0_149, %c2_150, %c0_151, %c0_152] : memref<2x3x32x32xbf16, #tpu.memory_space<vmem>>, vector<1x1x32x32xbf16>
    %147 = vector.shape_cast %146 : vector<1x1x32x32xbf16> to vector<32x32xbf16>
    %cst_153 = arith.constant dense<0.000000e+00> : vector<16x32xf32>
    %148 = tpu.matmul %116, %147, %cst_153 {dimension_numbers = #tpu.dot_dimension_numbers<[1], [0], [0], [1], [0, 0, 1, 1], [], []>} : vector<16x32xbf16>, vector<32x32xbf16>, vector<16x32xf32> -> vector<16x32xf32>
    %c0_154 = arith.constant 0 : index
    %c2_155 = arith.constant 2 : index
    %c0_156 = arith.constant 0 : index
    %c0_157 = arith.constant 0 : index
    %149 = vector.load %arg8[%c0_154, %c2_155, %c0_156, %c0_157] : memref<2x3x1x32xf32, #tpu.memory_space<vmem>>, vector<1x1x1x32xf32>
    %150 = vector.shape_cast %149 : vector<1x1x1x32xf32> to vector<1x32xf32>
    %151 = vector.broadcast %150 : vector<1x32xf32> to vector<16x32xf32>
    %152 = arith.addf %148, %151 : vector<16x32xf32>
    %c0_158 = arith.constant 0 : index
    %c2_159 = arith.constant 2 : index
    %c0_160 = arith.constant 0 : index
    %c0_161 = arith.constant 0 : index
    %153 = vector.load %arg7[%c0_158, %c2_159, %c0_160, %c0_161] : memref<2x3x32x32xbf16, #tpu.memory_space<vmem>>, vector<1x1x32x32xbf16>
    %154 = vector.shape_cast %153 : vector<1x1x32x32xbf16> to vector<32x32xbf16>
    %cst_162 = arith.constant dense<0.000000e+00> : vector<16x32xf32>
    %155 = tpu.matmul %117, %154, %cst_162 {dimension_numbers = #tpu.dot_dimension_numbers<[1], [0], [0], [1], [0, 0, 1, 1], [], []>} : vector<16x32xbf16>, vector<32x32xbf16>, vector<16x32xf32> -> vector<16x32xf32>
    %c0_163 = arith.constant 0 : index
    %c2_164 = arith.constant 2 : index
    %c0_165 = arith.constant 0 : index
    %c0_166 = arith.constant 0 : index
    %156 = vector.load %arg9[%c0_163, %c2_164, %c0_165, %c0_166] : memref<2x3x1x32xf32, #tpu.memory_space<vmem>>, vector<1x1x1x32xf32>
    %157 = vector.shape_cast %156 : vector<1x1x1x32xf32> to vector<1x32xf32>
    %158 = vector.broadcast %157 : vector<1x32xf32> to vector<16x32xf32>
    %159 = arith.addf %155, %158 : vector<16x32xf32>
    %160 = arith.addf %124, %131 : vector<16x32xf32>
    %161 = arith.negf %160 : vector<16x32xf32>
    %162 = math.exp %161 : vector<16x32xf32>
    %cst_167 = arith.constant 1.000000e+00 : f32
    %163 = vector.broadcast %cst_167 : f32 to vector<16x32xf32>
    %164 = arith.addf %163, %162 : vector<16x32xf32>
    %165 = arith.divf %163, %164 : vector<16x32xf32>
    %166 = arith.addf %138, %145 : vector<16x32xf32>
    %167 = arith.negf %166 : vector<16x32xf32>
    %168 = math.exp %167 : vector<16x32xf32>
    %cst_168 = arith.constant 1.000000e+00 : f32
    %169 = vector.broadcast %cst_168 : f32 to vector<16x32xf32>
    %170 = arith.addf %169, %168 : vector<16x32xf32>
    %171 = arith.divf %169, %170 : vector<16x32xf32>
    %172 = arith.mulf %165, %159 : vector<16x32xf32>
    %173 = arith.addf %152, %172 : vector<16x32xf32>
    %174 = math.tanh %173 : vector<16x32xf32>
    %cst_169 = arith.constant 1.000000e+00 : f32
    %175 = vector.broadcast %cst_169 : f32 to vector<16x32xf32>
    %176 = arith.subf %175, %171 : vector<16x32xf32>
    %177 = arith.mulf %176, %174 : vector<16x32xf32>
    %178 = arith.mulf %171, %90 : vector<16x32xf32>
    %179 = arith.addf %177, %178 : vector<16x32xf32>
    %cst_170 = arith.constant 0.000000e+00 : f32
    %180 = vector.broadcast %cst_170 : f32 to vector<16x32xf32>
    %181 = arith.maximumf %179, %180 : vector<16x32xf32>
    %182 = arith.truncf %181 : vector<16x32xf32> to vector<16x32xbf16>
    %c1_171 = arith.constant 1 : index
    %c0_172 = arith.constant 0 : index
    %c0_173 = arith.constant 0 : index
    %c0_174 = arith.constant 0 : index
    %183 = vector.load %arg4[%c1_171, %c0_172, %c0_173, %c0_174] : memref<2x3x32x32xbf16, #tpu.memory_space<vmem>>, vector<1x1x32x32xbf16>
    %184 = vector.shape_cast %183 : vector<1x1x32x32xbf16> to vector<32x32xbf16>
    %cst_175 = arith.constant dense<0.000000e+00> : vector<16x32xf32>
    %185 = tpu.matmul %182, %184, %cst_175 {dimension_numbers = #tpu.dot_dimension_numbers<[1], [0], [0], [1], [0, 0, 1, 1], [], []>} : vector<16x32xbf16>, vector<32x32xbf16>, vector<16x32xf32> -> vector<16x32xf32>
    %c1_176 = arith.constant 1 : index
    %c0_177 = arith.constant 0 : index
    %c0_178 = arith.constant 0 : index
    %c0_179 = arith.constant 0 : index
    %186 = vector.load %arg5[%c1_176, %c0_177, %c0_178, %c0_179] : memref<2x3x1x32xf32, #tpu.memory_space<vmem>>, vector<1x1x1x32xf32>
    %187 = vector.shape_cast %186 : vector<1x1x1x32xf32> to vector<1x32xf32>
    %188 = vector.broadcast %187 : vector<1x32xf32> to vector<16x32xf32>
    %189 = arith.addf %185, %188 : vector<16x32xf32>
    %c1_180 = arith.constant 1 : index
    %c1_181 = arith.constant 1 : index
    %c0_182 = arith.constant 0 : index
    %c0_183 = arith.constant 0 : index
    %190 = vector.load %arg4[%c1_180, %c1_181, %c0_182, %c0_183] : memref<2x3x32x32xbf16, #tpu.memory_space<vmem>>, vector<1x1x32x32xbf16>
    %191 = vector.shape_cast %190 : vector<1x1x32x32xbf16> to vector<32x32xbf16>
    %cst_184 = arith.constant dense<0.000000e+00> : vector<16x32xf32>
    %192 = tpu.matmul %182, %191, %cst_184 {dimension_numbers = #tpu.dot_dimension_numbers<[1], [0], [0], [1], [0, 0, 1, 1], [], []>} : vector<16x32xbf16>, vector<32x32xbf16>, vector<16x32xf32> -> vector<16x32xf32>
    %c1_185 = arith.constant 1 : index
    %c1_186 = arith.constant 1 : index
    %c0_187 = arith.constant 0 : index
    %c0_188 = arith.constant 0 : index
    %193 = vector.load %arg5[%c1_185, %c1_186, %c0_187, %c0_188] : memref<2x3x1x32xf32, #tpu.memory_space<vmem>>, vector<1x1x1x32xf32>
    %194 = vector.shape_cast %193 : vector<1x1x1x32xf32> to vector<1x32xf32>
    %195 = vector.broadcast %194 : vector<1x32xf32> to vector<16x32xf32>
    %196 = arith.addf %192, %195 : vector<16x32xf32>
    %c1_189 = arith.constant 1 : index
    %c2_190 = arith.constant 2 : index
    %c0_191 = arith.constant 0 : index
    %c0_192 = arith.constant 0 : index
    %197 = vector.load %arg4[%c1_189, %c2_190, %c0_191, %c0_192] : memref<2x3x32x32xbf16, #tpu.memory_space<vmem>>, vector<1x1x32x32xbf16>
    %198 = vector.shape_cast %197 : vector<1x1x32x32xbf16> to vector<32x32xbf16>
    %cst_193 = arith.constant dense<0.000000e+00> : vector<16x32xf32>
    %199 = tpu.matmul %182, %198, %cst_193 {dimension_numbers = #tpu.dot_dimension_numbers<[1], [0], [0], [1], [0, 0, 1, 1], [], []>} : vector<16x32xbf16>, vector<32x32xbf16>, vector<16x32xf32> -> vector<16x32xf32>
    %c1_194 = arith.constant 1 : index
    %c2_195 = arith.constant 2 : index
    %c0_196 = arith.constant 0 : index
    %c0_197 = arith.constant 0 : index
    %200 = vector.load %arg5[%c1_194, %c2_195, %c0_196, %c0_197] : memref<2x3x1x32xf32, #tpu.memory_space<vmem>>, vector<1x1x1x32xf32>
    %201 = vector.shape_cast %200 : vector<1x1x1x32xf32> to vector<1x32xf32>
    %202 = vector.broadcast %201 : vector<1x32xf32> to vector<16x32xf32>
    %203 = arith.addf %199, %202 : vector<16x32xf32>
    %204 = tpu.concatenate %189, %196, %203 in 0 : vector<16x32xf32>, vector<16x32xf32>, vector<16x32xf32> -> vector<48x32xf32>
    %205 = arith.truncf %204 : vector<48x32xf32> to vector<48x32xbf16>
    %cst_198 = arith.constant dense<0.000000e+00> : vector<16x32xf32>
    %206 = tpu.matmul %0, %205, %cst_198 {dimension_numbers = #tpu.dot_dimension_numbers<[1], [0], [0], [1], [0, 0, 1, 1], [], []>} : vector<16x48xbf16>, vector<48x32xbf16>, vector<16x32xf32> -> vector<16x32xf32>
    %207 = arith.truncf %206 : vector<16x32xf32> to vector<16x32xbf16>
    %208 = arith.truncf %181 : vector<16x32xf32> to vector<16x32xbf16>
    %c1_199 = arith.constant 1 : index
    %c0_200 = arith.constant 0 : index
    %c0_201 = arith.constant 0 : index
    %c0_202 = arith.constant 0 : index
    %209 = vector.load %arg6[%c1_199, %c0_200, %c0_201, %c0_202] : memref<2x3x32x32xbf16, #tpu.memory_space<vmem>>, vector<1x1x32x32xbf16>
    %210 = vector.shape_cast %209 : vector<1x1x32x32xbf16> to vector<32x32xbf16>
    %cst_203 = arith.constant dense<0.000000e+00> : vector<16x32xf32>
    %211 = tpu.matmul %207, %210, %cst_203 {dimension_numbers = #tpu.dot_dimension_numbers<[1], [0], [0], [1], [0, 0, 1, 1], [], []>} : vector<16x32xbf16>, vector<32x32xbf16>, vector<16x32xf32> -> vector<16x32xf32>
    %c1_204 = arith.constant 1 : index
    %c0_205 = arith.constant 0 : index
    %c0_206 = arith.constant 0 : index
    %c0_207 = arith.constant 0 : index
    %212 = vector.load %arg8[%c1_204, %c0_205, %c0_206, %c0_207] : memref<2x3x1x32xf32, #tpu.memory_space<vmem>>, vector<1x1x1x32xf32>
    %213 = vector.shape_cast %212 : vector<1x1x1x32xf32> to vector<1x32xf32>
    %214 = vector.broadcast %213 : vector<1x32xf32> to vector<16x32xf32>
    %215 = arith.addf %211, %214 : vector<16x32xf32>
    %c1_208 = arith.constant 1 : index
    %c0_209 = arith.constant 0 : index
    %c0_210 = arith.constant 0 : index
    %c0_211 = arith.constant 0 : index
    %216 = vector.load %arg7[%c1_208, %c0_209, %c0_210, %c0_211] : memref<2x3x32x32xbf16, #tpu.memory_space<vmem>>, vector<1x1x32x32xbf16>
    %217 = vector.shape_cast %216 : vector<1x1x32x32xbf16> to vector<32x32xbf16>
    %cst_212 = arith.constant dense<0.000000e+00> : vector<16x32xf32>
    %218 = tpu.matmul %208, %217, %cst_212 {dimension_numbers = #tpu.dot_dimension_numbers<[1], [0], [0], [1], [0, 0, 1, 1], [], []>} : vector<16x32xbf16>, vector<32x32xbf16>, vector<16x32xf32> -> vector<16x32xf32>
    %c1_213 = arith.constant 1 : index
    %c0_214 = arith.constant 0 : index
    %c0_215 = arith.constant 0 : index
    %c0_216 = arith.constant 0 : index
    %219 = vector.load %arg9[%c1_213, %c0_214, %c0_215, %c0_216] : memref<2x3x1x32xf32, #tpu.memory_space<vmem>>, vector<1x1x1x32xf32>
    %220 = vector.shape_cast %219 : vector<1x1x1x32xf32> to vector<1x32xf32>
    %221 = vector.broadcast %220 : vector<1x32xf32> to vector<16x32xf32>
    %222 = arith.addf %218, %221 : vector<16x32xf32>
    %c1_217 = arith.constant 1 : index
    %c1_218 = arith.constant 1 : index
    %c0_219 = arith.constant 0 : index
    %c0_220 = arith.constant 0 : index
    %223 = vector.load %arg6[%c1_217, %c1_218, %c0_219, %c0_220] : memref<2x3x32x32xbf16, #tpu.memory_space<vmem>>, vector<1x1x32x32xbf16>
    %224 = vector.shape_cast %223 : vector<1x1x32x32xbf16> to vector<32x32xbf16>
    %cst_221 = arith.constant dense<0.000000e+00> : vector<16x32xf32>
    %225 = tpu.matmul %207, %224, %cst_221 {dimension_numbers = #tpu.dot_dimension_numbers<[1], [0], [0], [1], [0, 0, 1, 1], [], []>} : vector<16x32xbf16>, vector<32x32xbf16>, vector<16x32xf32> -> vector<16x32xf32>
    %c1_222 = arith.constant 1 : index
    %c1_223 = arith.constant 1 : index
    %c0_224 = arith.constant 0 : index
    %c0_225 = arith.constant 0 : index
    %226 = vector.load %arg8[%c1_222, %c1_223, %c0_224, %c0_225] : memref<2x3x1x32xf32, #tpu.memory_space<vmem>>, vector<1x1x1x32xf32>
    %227 = vector.shape_cast %226 : vector<1x1x1x32xf32> to vector<1x32xf32>
    %228 = vector.broadcast %227 : vector<1x32xf32> to vector<16x32xf32>
    %229 = arith.addf %225, %228 : vector<16x32xf32>
    %c1_226 = arith.constant 1 : index
    %c1_227 = arith.constant 1 : index
    %c0_228 = arith.constant 0 : index
    %c0_229 = arith.constant 0 : index
    %230 = vector.load %arg7[%c1_226, %c1_227, %c0_228, %c0_229] : memref<2x3x32x32xbf16, #tpu.memory_space<vmem>>, vector<1x1x32x32xbf16>
    %231 = vector.shape_cast %230 : vector<1x1x32x32xbf16> to vector<32x32xbf16>
    %cst_230 = arith.constant dense<0.000000e+00> : vector<16x32xf32>
    %232 = tpu.matmul %208, %231, %cst_230 {dimension_numbers = #tpu.dot_dimension_numbers<[1], [0], [0], [1], [0, 0, 1, 1], [], []>} : vector<16x32xbf16>, vector<32x32xbf16>, vector<16x32xf32> -> vector<16x32xf32>
    %c1_231 = arith.constant 1 : index
    %c1_232 = arith.constant 1 : index
    %c0_233 = arith.constant 0 : index
    %c0_234 = arith.constant 0 : index
    %233 = vector.load %arg9[%c1_231, %c1_232, %c0_233, %c0_234] : memref<2x3x1x32xf32, #tpu.memory_space<vmem>>, vector<1x1x1x32xf32>
    %234 = vector.shape_cast %233 : vector<1x1x1x32xf32> to vector<1x32xf32>
    %235 = vector.broadcast %234 : vector<1x32xf32> to vector<16x32xf32>
    %236 = arith.addf %232, %235 : vector<16x32xf32>
    %c1_235 = arith.constant 1 : index
    %c2_236 = arith.constant 2 : index
    %c0_237 = arith.constant 0 : index
    %c0_238 = arith.constant 0 : index
    %237 = vector.load %arg6[%c1_235, %c2_236, %c0_237, %c0_238] : memref<2x3x32x32xbf16, #tpu.memory_space<vmem>>, vector<1x1x32x32xbf16>
    %238 = vector.shape_cast %237 : vector<1x1x32x32xbf16> to vector<32x32xbf16>
    %cst_239 = arith.constant dense<0.000000e+00> : vector<16x32xf32>
    %239 = tpu.matmul %207, %238, %cst_239 {dimension_numbers = #tpu.dot_dimension_numbers<[1], [0], [0], [1], [0, 0, 1, 1], [], []>} : vector<16x32xbf16>, vector<32x32xbf16>, vector<16x32xf32> -> vector<16x32xf32>
    %c1_240 = arith.constant 1 : index
    %c2_241 = arith.constant 2 : index
    %c0_242 = arith.constant 0 : index
    %c0_243 = arith.constant 0 : index
    %240 = vector.load %arg8[%c1_240, %c2_241, %c0_242, %c0_243] : memref<2x3x1x32xf32, #tpu.memory_space<vmem>>, vector<1x1x1x32xf32>
    %241 = vector.shape_cast %240 : vector<1x1x1x32xf32> to vector<1x32xf32>
    %242 = vector.broadcast %241 : vector<1x32xf32> to vector<16x32xf32>
    %243 = arith.addf %239, %242 : vector<16x32xf32>
    %c1_244 = arith.constant 1 : index
    %c2_245 = arith.constant 2 : index
    %c0_246 = arith.constant 0 : index
    %c0_247 = arith.constant 0 : index
    %244 = vector.load %arg7[%c1_244, %c2_245, %c0_246, %c0_247] : memref<2x3x32x32xbf16, #tpu.memory_space<vmem>>, vector<1x1x32x32xbf16>
    %245 = vector.shape_cast %244 : vector<1x1x32x32xbf16> to vector<32x32xbf16>
    %cst_248 = arith.constant dense<0.000000e+00> : vector<16x32xf32>
    %246 = tpu.matmul %208, %245, %cst_248 {dimension_numbers = #tpu.dot_dimension_numbers<[1], [0], [0], [1], [0, 0, 1, 1], [], []>} : vector<16x32xbf16>, vector<32x32xbf16>, vector<16x32xf32> -> vector<16x32xf32>
    %c1_249 = arith.constant 1 : index
    %c2_250 = arith.constant 2 : index
    %c0_251 = arith.constant 0 : index
    %c0_252 = arith.constant 0 : index
    %247 = vector.load %arg9[%c1_249, %c2_250, %c0_251, %c0_252] : memref<2x3x1x32xf32, #tpu.memory_space<vmem>>, vector<1x1x1x32xf32>
    %248 = vector.shape_cast %247 : vector<1x1x1x32xf32> to vector<1x32xf32>
    %249 = vector.broadcast %248 : vector<1x32xf32> to vector<16x32xf32>
    %250 = arith.addf %246, %249 : vector<16x32xf32>
    %251 = arith.addf %215, %222 : vector<16x32xf32>
    %252 = arith.negf %251 : vector<16x32xf32>
    %253 = math.exp %252 : vector<16x32xf32>
    %cst_253 = arith.constant 1.000000e+00 : f32
    %254 = vector.broadcast %cst_253 : f32 to vector<16x32xf32>
    %255 = arith.addf %254, %253 : vector<16x32xf32>
    %256 = arith.divf %254, %255 : vector<16x32xf32>
    %257 = arith.addf %229, %236 : vector<16x32xf32>
    %258 = arith.negf %257 : vector<16x32xf32>
    %259 = math.exp %258 : vector<16x32xf32>
    %cst_254 = arith.constant 1.000000e+00 : f32
    %260 = vector.broadcast %cst_254 : f32 to vector<16x32xf32>
    %261 = arith.addf %260, %259 : vector<16x32xf32>
    %262 = arith.divf %260, %261 : vector<16x32xf32>
    %263 = arith.mulf %256, %250 : vector<16x32xf32>
    %264 = arith.addf %243, %263 : vector<16x32xf32>
    %265 = math.tanh %264 : vector<16x32xf32>
    %cst_255 = arith.constant 1.000000e+00 : f32
    %266 = vector.broadcast %cst_255 : f32 to vector<16x32xf32>
    %267 = arith.subf %266, %262 : vector<16x32xf32>
    %268 = arith.mulf %267, %265 : vector<16x32xf32>
    %269 = arith.mulf %262, %181 : vector<16x32xf32>
    %270 = arith.addf %268, %269 : vector<16x32xf32>
    %271 = arith.truncf %270 : vector<16x32xf32> to vector<16x32xbf16>
    %c1_256 = arith.constant 1 : index
    %c0_257 = arith.constant 0 : index
    %c0_258 = arith.constant 0 : index
    %c0_259 = arith.constant 0 : index
    %272 = vector.load %arg4[%c1_256, %c0_257, %c0_258, %c0_259] : memref<2x3x32x32xbf16, #tpu.memory_space<vmem>>, vector<1x1x32x32xbf16>
    %273 = vector.shape_cast %272 : vector<1x1x32x32xbf16> to vector<32x32xbf16>
    %cst_260 = arith.constant dense<0.000000e+00> : vector<16x32xf32>
    %274 = tpu.matmul %271, %273, %cst_260 {dimension_numbers = #tpu.dot_dimension_numbers<[1], [0], [0], [1], [0, 0, 1, 1], [], []>} : vector<16x32xbf16>, vector<32x32xbf16>, vector<16x32xf32> -> vector<16x32xf32>
    %c1_261 = arith.constant 1 : index
    %c0_262 = arith.constant 0 : index
    %c0_263 = arith.constant 0 : index
    %c0_264 = arith.constant 0 : index
    %275 = vector.load %arg5[%c1_261, %c0_262, %c0_263, %c0_264] : memref<2x3x1x32xf32, #tpu.memory_space<vmem>>, vector<1x1x1x32xf32>
    %276 = vector.shape_cast %275 : vector<1x1x1x32xf32> to vector<1x32xf32>
    %277 = vector.broadcast %276 : vector<1x32xf32> to vector<16x32xf32>
    %278 = arith.addf %274, %277 : vector<16x32xf32>
    %c1_265 = arith.constant 1 : index
    %c1_266 = arith.constant 1 : index
    %c0_267 = arith.constant 0 : index
    %c0_268 = arith.constant 0 : index
    %279 = vector.load %arg4[%c1_265, %c1_266, %c0_267, %c0_268] : memref<2x3x32x32xbf16, #tpu.memory_space<vmem>>, vector<1x1x32x32xbf16>
    %280 = vector.shape_cast %279 : vector<1x1x32x32xbf16> to vector<32x32xbf16>
    %cst_269 = arith.constant dense<0.000000e+00> : vector<16x32xf32>
    %281 = tpu.matmul %271, %280, %cst_269 {dimension_numbers = #tpu.dot_dimension_numbers<[1], [0], [0], [1], [0, 0, 1, 1], [], []>} : vector<16x32xbf16>, vector<32x32xbf16>, vector<16x32xf32> -> vector<16x32xf32>
    %c1_270 = arith.constant 1 : index
    %c1_271 = arith.constant 1 : index
    %c0_272 = arith.constant 0 : index
    %c0_273 = arith.constant 0 : index
    %282 = vector.load %arg5[%c1_270, %c1_271, %c0_272, %c0_273] : memref<2x3x1x32xf32, #tpu.memory_space<vmem>>, vector<1x1x1x32xf32>
    %283 = vector.shape_cast %282 : vector<1x1x1x32xf32> to vector<1x32xf32>
    %284 = vector.broadcast %283 : vector<1x32xf32> to vector<16x32xf32>
    %285 = arith.addf %281, %284 : vector<16x32xf32>
    %c1_274 = arith.constant 1 : index
    %c2_275 = arith.constant 2 : index
    %c0_276 = arith.constant 0 : index
    %c0_277 = arith.constant 0 : index
    %286 = vector.load %arg4[%c1_274, %c2_275, %c0_276, %c0_277] : memref<2x3x32x32xbf16, #tpu.memory_space<vmem>>, vector<1x1x32x32xbf16>
    %287 = vector.shape_cast %286 : vector<1x1x32x32xbf16> to vector<32x32xbf16>
    %cst_278 = arith.constant dense<0.000000e+00> : vector<16x32xf32>
    %288 = tpu.matmul %271, %287, %cst_278 {dimension_numbers = #tpu.dot_dimension_numbers<[1], [0], [0], [1], [0, 0, 1, 1], [], []>} : vector<16x32xbf16>, vector<32x32xbf16>, vector<16x32xf32> -> vector<16x32xf32>
    %c1_279 = arith.constant 1 : index
    %c2_280 = arith.constant 2 : index
    %c0_281 = arith.constant 0 : index
    %c0_282 = arith.constant 0 : index
    %289 = vector.load %arg5[%c1_279, %c2_280, %c0_281, %c0_282] : memref<2x3x1x32xf32, #tpu.memory_space<vmem>>, vector<1x1x1x32xf32>
    %290 = vector.shape_cast %289 : vector<1x1x1x32xf32> to vector<1x32xf32>
    %291 = vector.broadcast %290 : vector<1x32xf32> to vector<16x32xf32>
    %292 = arith.addf %288, %291 : vector<16x32xf32>
    %293 = tpu.concatenate %278, %285, %292 in 0 : vector<16x32xf32>, vector<16x32xf32>, vector<16x32xf32> -> vector<48x32xf32>
    %294 = arith.truncf %293 : vector<48x32xf32> to vector<48x32xbf16>
    %cst_283 = arith.constant dense<0.000000e+00> : vector<16x32xf32>
    %295 = tpu.matmul %0, %294, %cst_283 {dimension_numbers = #tpu.dot_dimension_numbers<[1], [0], [0], [1], [0, 0, 1, 1], [], []>} : vector<16x48xbf16>, vector<48x32xbf16>, vector<16x32xf32> -> vector<16x32xf32>
    %296 = arith.truncf %295 : vector<16x32xf32> to vector<16x32xbf16>
    %297 = arith.truncf %270 : vector<16x32xf32> to vector<16x32xbf16>
    %c1_284 = arith.constant 1 : index
    %c0_285 = arith.constant 0 : index
    %c0_286 = arith.constant 0 : index
    %c0_287 = arith.constant 0 : index
    %298 = vector.load %arg6[%c1_284, %c0_285, %c0_286, %c0_287] : memref<2x3x32x32xbf16, #tpu.memory_space<vmem>>, vector<1x1x32x32xbf16>
    %299 = vector.shape_cast %298 : vector<1x1x32x32xbf16> to vector<32x32xbf16>
    %cst_288 = arith.constant dense<0.000000e+00> : vector<16x32xf32>
    %300 = tpu.matmul %296, %299, %cst_288 {dimension_numbers = #tpu.dot_dimension_numbers<[1], [0], [0], [1], [0, 0, 1, 1], [], []>} : vector<16x32xbf16>, vector<32x32xbf16>, vector<16x32xf32> -> vector<16x32xf32>
    %c1_289 = arith.constant 1 : index
    %c0_290 = arith.constant 0 : index
    %c0_291 = arith.constant 0 : index
    %c0_292 = arith.constant 0 : index
    %301 = vector.load %arg8[%c1_289, %c0_290, %c0_291, %c0_292] : memref<2x3x1x32xf32, #tpu.memory_space<vmem>>, vector<1x1x1x32xf32>
    %302 = vector.shape_cast %301 : vector<1x1x1x32xf32> to vector<1x32xf32>
    %303 = vector.broadcast %302 : vector<1x32xf32> to vector<16x32xf32>
    %304 = arith.addf %300, %303 : vector<16x32xf32>
    %c1_293 = arith.constant 1 : index
    %c0_294 = arith.constant 0 : index
    %c0_295 = arith.constant 0 : index
    %c0_296 = arith.constant 0 : index
    %305 = vector.load %arg7[%c1_293, %c0_294, %c0_295, %c0_296] : memref<2x3x32x32xbf16, #tpu.memory_space<vmem>>, vector<1x1x32x32xbf16>
    %306 = vector.shape_cast %305 : vector<1x1x32x32xbf16> to vector<32x32xbf16>
    %cst_297 = arith.constant dense<0.000000e+00> : vector<16x32xf32>
    %307 = tpu.matmul %297, %306, %cst_297 {dimension_numbers = #tpu.dot_dimension_numbers<[1], [0], [0], [1], [0, 0, 1, 1], [], []>} : vector<16x32xbf16>, vector<32x32xbf16>, vector<16x32xf32> -> vector<16x32xf32>
    %c1_298 = arith.constant 1 : index
    %c0_299 = arith.constant 0 : index
    %c0_300 = arith.constant 0 : index
    %c0_301 = arith.constant 0 : index
    %308 = vector.load %arg9[%c1_298, %c0_299, %c0_300, %c0_301] : memref<2x3x1x32xf32, #tpu.memory_space<vmem>>, vector<1x1x1x32xf32>
    %309 = vector.shape_cast %308 : vector<1x1x1x32xf32> to vector<1x32xf32>
    %310 = vector.broadcast %309 : vector<1x32xf32> to vector<16x32xf32>
    %311 = arith.addf %307, %310 : vector<16x32xf32>
    %c1_302 = arith.constant 1 : index
    %c1_303 = arith.constant 1 : index
    %c0_304 = arith.constant 0 : index
    %c0_305 = arith.constant 0 : index
    %312 = vector.load %arg6[%c1_302, %c1_303, %c0_304, %c0_305] : memref<2x3x32x32xbf16, #tpu.memory_space<vmem>>, vector<1x1x32x32xbf16>
    %313 = vector.shape_cast %312 : vector<1x1x32x32xbf16> to vector<32x32xbf16>
    %cst_306 = arith.constant dense<0.000000e+00> : vector<16x32xf32>
    %314 = tpu.matmul %296, %313, %cst_306 {dimension_numbers = #tpu.dot_dimension_numbers<[1], [0], [0], [1], [0, 0, 1, 1], [], []>} : vector<16x32xbf16>, vector<32x32xbf16>, vector<16x32xf32> -> vector<16x32xf32>
    %c1_307 = arith.constant 1 : index
    %c1_308 = arith.constant 1 : index
    %c0_309 = arith.constant 0 : index
    %c0_310 = arith.constant 0 : index
    %315 = vector.load %arg8[%c1_307, %c1_308, %c0_309, %c0_310] : memref<2x3x1x32xf32, #tpu.memory_space<vmem>>, vector<1x1x1x32xf32>
    %316 = vector.shape_cast %315 : vector<1x1x1x32xf32> to vector<1x32xf32>
    %317 = vector.broadcast %316 : vector<1x32xf32> to vector<16x32xf32>
    %318 = arith.addf %314, %317 : vector<16x32xf32>
    %c1_311 = arith.constant 1 : index
    %c1_312 = arith.constant 1 : index
    %c0_313 = arith.constant 0 : index
    %c0_314 = arith.constant 0 : index
    %319 = vector.load %arg7[%c1_311, %c1_312, %c0_313, %c0_314] : memref<2x3x32x32xbf16, #tpu.memory_space<vmem>>, vector<1x1x32x32xbf16>
    %320 = vector.shape_cast %319 : vector<1x1x32x32xbf16> to vector<32x32xbf16>
    %cst_315 = arith.constant dense<0.000000e+00> : vector<16x32xf32>
    %321 = tpu.matmul %297, %320, %cst_315 {dimension_numbers = #tpu.dot_dimension_numbers<[1], [0], [0], [1], [0, 0, 1, 1], [], []>} : vector<16x32xbf16>, vector<32x32xbf16>, vector<16x32xf32> -> vector<16x32xf32>
    %c1_316 = arith.constant 1 : index
    %c1_317 = arith.constant 1 : index
    %c0_318 = arith.constant 0 : index
    %c0_319 = arith.constant 0 : index
    %322 = vector.load %arg9[%c1_316, %c1_317, %c0_318, %c0_319] : memref<2x3x1x32xf32, #tpu.memory_space<vmem>>, vector<1x1x1x32xf32>
    %323 = vector.shape_cast %322 : vector<1x1x1x32xf32> to vector<1x32xf32>
    %324 = vector.broadcast %323 : vector<1x32xf32> to vector<16x32xf32>
    %325 = arith.addf %321, %324 : vector<16x32xf32>
    %c1_320 = arith.constant 1 : index
    %c2_321 = arith.constant 2 : index
    %c0_322 = arith.constant 0 : index
    %c0_323 = arith.constant 0 : index
    %326 = vector.load %arg6[%c1_320, %c2_321, %c0_322, %c0_323] : memref<2x3x32x32xbf16, #tpu.memory_space<vmem>>, vector<1x1x32x32xbf16>
    %327 = vector.shape_cast %326 : vector<1x1x32x32xbf16> to vector<32x32xbf16>
    %cst_324 = arith.constant dense<0.000000e+00> : vector<16x32xf32>
    %328 = tpu.matmul %296, %327, %cst_324 {dimension_numbers = #tpu.dot_dimension_numbers<[1], [0], [0], [1], [0, 0, 1, 1], [], []>} : vector<16x32xbf16>, vector<32x32xbf16>, vector<16x32xf32> -> vector<16x32xf32>
    %c1_325 = arith.constant 1 : index
    %c2_326 = arith.constant 2 : index
    %c0_327 = arith.constant 0 : index
    %c0_328 = arith.constant 0 : index
    %329 = vector.load %arg8[%c1_325, %c2_326, %c0_327, %c0_328] : memref<2x3x1x32xf32, #tpu.memory_space<vmem>>, vector<1x1x1x32xf32>
    %330 = vector.shape_cast %329 : vector<1x1x1x32xf32> to vector<1x32xf32>
    %331 = vector.broadcast %330 : vector<1x32xf32> to vector<16x32xf32>
    %332 = arith.addf %328, %331 : vector<16x32xf32>
    %c1_329 = arith.constant 1 : index
    %c2_330 = arith.constant 2 : index
    %c0_331 = arith.constant 0 : index
    %c0_332 = arith.constant 0 : index
    %333 = vector.load %arg7[%c1_329, %c2_330, %c0_331, %c0_332] : memref<2x3x32x32xbf16, #tpu.memory_space<vmem>>, vector<1x1x32x32xbf16>
    %334 = vector.shape_cast %333 : vector<1x1x32x32xbf16> to vector<32x32xbf16>
    %cst_333 = arith.constant dense<0.000000e+00> : vector<16x32xf32>
    %335 = tpu.matmul %297, %334, %cst_333 {dimension_numbers = #tpu.dot_dimension_numbers<[1], [0], [0], [1], [0, 0, 1, 1], [], []>} : vector<16x32xbf16>, vector<32x32xbf16>, vector<16x32xf32> -> vector<16x32xf32>
    %c1_334 = arith.constant 1 : index
    %c2_335 = arith.constant 2 : index
    %c0_336 = arith.constant 0 : index
    %c0_337 = arith.constant 0 : index
    %336 = vector.load %arg9[%c1_334, %c2_335, %c0_336, %c0_337] : memref<2x3x1x32xf32, #tpu.memory_space<vmem>>, vector<1x1x1x32xf32>
    %337 = vector.shape_cast %336 : vector<1x1x1x32xf32> to vector<1x32xf32>
    %338 = vector.broadcast %337 : vector<1x32xf32> to vector<16x32xf32>
    %339 = arith.addf %335, %338 : vector<16x32xf32>
    %340 = arith.addf %304, %311 : vector<16x32xf32>
    %341 = arith.negf %340 : vector<16x32xf32>
    %342 = math.exp %341 : vector<16x32xf32>
    %cst_338 = arith.constant 1.000000e+00 : f32
    %343 = vector.broadcast %cst_338 : f32 to vector<16x32xf32>
    %344 = arith.addf %343, %342 : vector<16x32xf32>
    %345 = arith.divf %343, %344 : vector<16x32xf32>
    %346 = arith.addf %318, %325 : vector<16x32xf32>
    %347 = arith.negf %346 : vector<16x32xf32>
    %348 = math.exp %347 : vector<16x32xf32>
    %cst_339 = arith.constant 1.000000e+00 : f32
    %349 = vector.broadcast %cst_339 : f32 to vector<16x32xf32>
    %350 = arith.addf %349, %348 : vector<16x32xf32>
    %351 = arith.divf %349, %350 : vector<16x32xf32>
    %352 = arith.mulf %345, %339 : vector<16x32xf32>
    %353 = arith.addf %332, %352 : vector<16x32xf32>
    %354 = math.tanh %353 : vector<16x32xf32>
    %cst_340 = arith.constant 1.000000e+00 : f32
    %355 = vector.broadcast %cst_340 : f32 to vector<16x32xf32>
    %356 = arith.subf %355, %351 : vector<16x32xf32>
    %357 = arith.mulf %356, %354 : vector<16x32xf32>
    %358 = arith.mulf %351, %270 : vector<16x32xf32>
    %359 = arith.addf %357, %358 : vector<16x32xf32>
    %cst_341 = arith.constant 0.000000e+00 : f32
    %360 = vector.broadcast %cst_341 : f32 to vector<16x32xf32>
    %361 = arith.maximumf %359, %360 : vector<16x32xf32>
    %362 = arith.truncf %361 : vector<16x32xf32> to vector<16x32xbf16>
    %c0_342 = arith.constant 0 : index
    %c0_343 = arith.constant 0 : index
    %363 = vector.load %arg10[%c0_342, %c0_343] : memref<32x64xbf16, #tpu.memory_space<vmem>>, vector<32x64xbf16>
    %cst_344 = arith.constant dense<0.000000e+00> : vector<16x64xf32>
    %364 = tpu.matmul %362, %363, %cst_344 {dimension_numbers = #tpu.dot_dimension_numbers<[1], [0], [0], [1], [0, 0, 1, 1], [], []>} : vector<16x32xbf16>, vector<32x64xbf16>, vector<16x64xf32> -> vector<16x64xf32>
    %c0_345 = arith.constant 0 : index
    %c0_346 = arith.constant 0 : index
    %365 = vector.load %arg11[%c0_345, %c0_346] : memref<1x64xf32, #tpu.memory_space<vmem>>, vector<1x64xf32>
    %366 = vector.broadcast %365 : vector<1x64xf32> to vector<16x64xf32>
    %367 = arith.addf %364, %366 : vector<16x64xf32>
    %cst_347 = arith.constant 0.000000e+00 : f32
    %368 = vector.broadcast %cst_347 : f32 to vector<16x64xf32>
    %369 = arith.maximumf %367, %368 : vector<16x64xf32>
    %370 = arith.truncf %369 : vector<16x64xf32> to vector<16x64xbf16>
    %c0_348 = arith.constant 0 : index
    %c0_349 = arith.constant 0 : index
    %371 = vector.load %arg12[%c0_348, %c0_349] : memref<64x32xbf16, #tpu.memory_space<vmem>>, vector<64x32xbf16>
    %cst_350 = arith.constant dense<0.000000e+00> : vector<16x32xf32>
    %372 = tpu.matmul %370, %371, %cst_350 {dimension_numbers = #tpu.dot_dimension_numbers<[1], [0], [0], [1], [0, 0, 1, 1], [], []>} : vector<16x64xbf16>, vector<64x32xbf16>, vector<16x32xf32> -> vector<16x32xf32>
    %c0_351 = arith.constant 0 : index
    %c0_352 = arith.constant 0 : index
    %373 = vector.load %arg13[%c0_351, %c0_352] : memref<1x32xf32, #tpu.memory_space<vmem>>, vector<1x32xf32>
    %374 = vector.broadcast %373 : vector<1x32xf32> to vector<16x32xf32>
    %375 = arith.addf %372, %374 : vector<16x32xf32>
    %cst_353 = arith.constant 0.000000e+00 : f32
    %376 = vector.broadcast %cst_353 : f32 to vector<16x32xf32>
    %377 = arith.maximumf %375, %376 : vector<16x32xf32>
    %378 = arith.truncf %377 : vector<16x32xf32> to vector<16x32xbf16>
    %c0_354 = arith.constant 0 : index
    %c0_355 = arith.constant 0 : index
    %379 = vector.load %arg14[%c0_354, %c0_355] : memref<1x32xbf16, #tpu.memory_space<vmem>>, vector<1x32xbf16>
    %cst_356 = arith.constant dense<0.000000e+00> : vector<1x16xf32>
    %380 = tpu.matmul %379, %378, %cst_356 {dimension_numbers = #tpu.dot_dimension_numbers<[1], [1], [0], [0], [0, 0, 1, 0], [], []>} : vector<1x32xbf16>, vector<16x32xbf16>, vector<1x16xf32> -> vector<1x16xf32>
    %c0_357 = arith.constant 0 : index
    %c0_358 = arith.constant 0 : index
    %381 = vector.load %arg15[%c0_357, %c0_358] : memref<1x32xbf16, #tpu.memory_space<vmem>>, vector<1x32xbf16>
    %cst_359 = arith.constant dense<0.000000e+00> : vector<1x16xf32>
    %382 = tpu.matmul %381, %378, %cst_359 {dimension_numbers = #tpu.dot_dimension_numbers<[1], [1], [0], [0], [0, 0, 1, 0], [], []>} : vector<1x32xbf16>, vector<16x32xbf16>, vector<1x16xf32> -> vector<1x16xf32>
    %383 = tpu.iota {dimensions = array<i32: 0>} : vector<16x128xi32>
    %c0_360 = arith.constant 0 : index
    %c0_361 = arith.constant 0 : index
    %384 = vector.load %arg2[%c0_360, %c0_361] : memref<1x128xi32, #tpu.memory_space<vmem>>, vector<1x128xi32>
    %385 = vector.broadcast %384 : vector<1x128xi32> to vector<16x128xi32>
    %386 = arith.cmpi eq, %383, %385 : vector<16x128xi32>
    %387 = arith.extui %386 : vector<16x128xi1> to vector<16x128xi32>
    %388 = arith.sitofp %387 : vector<16x128xi32> to vector<16x128xf32>
    %c0_362 = arith.constant 0 : index
    %c0_363 = arith.constant 0 : index
    %389 = vector.load %arg3[%c0_362, %c0_363] : memref<1x128xi32, #tpu.memory_space<vmem>>, vector<1x128xi32>
    %390 = vector.broadcast %389 : vector<1x128xi32> to vector<16x128xi32>
    %391 = arith.cmpi eq, %383, %390 : vector<16x128xi32>
    %392 = arith.extui %391 : vector<16x128xi1> to vector<16x128xi32>
    %393 = arith.sitofp %392 : vector<16x128xi32> to vector<16x128xf32>
    %cst_364 = arith.constant dense<0.000000e+00> : vector<1x128xf32>
    %394 = tpu.matmul %380, %388, %cst_364 {dimension_numbers = #tpu.dot_dimension_numbers<[1], [0], [0], [1], [0, 0, 1, 1], [], []>} : vector<1x16xf32>, vector<16x128xf32>, vector<1x128xf32> -> vector<1x128xf32>
    %cst_365 = arith.constant dense<0.000000e+00> : vector<1x128xf32>
    %395 = tpu.matmul %382, %393, %cst_365 {dimension_numbers = #tpu.dot_dimension_numbers<[1], [0], [0], [1], [0, 0, 1, 1], [], []>} : vector<1x16xf32>, vector<16x128xf32>, vector<1x128xf32> -> vector<1x128xf32>
    %396 = arith.addf %394, %395 : vector<1x128xf32>
    %c0_366 = arith.constant 0 : index
    %c0_367 = arith.constant 0 : index
    %397 = vector.load %arg16[%c0_366, %c0_367] : memref<1x1xf32, #tpu.memory_space<vmem>>, vector<1x1xf32>
    %398 = vector.broadcast %397 : vector<1x1xf32> to vector<1x128xf32>
    %399 = arith.addf %396, %398 : vector<1x128xf32>
    %400 = arith.negf %399 : vector<1x128xf32>
    %401 = math.exp %400 : vector<1x128xf32>
    %cst_368 = arith.constant 1.000000e+00 : f32
    %402 = vector.broadcast %cst_368 : f32 to vector<1x128xf32>
    %403 = arith.addf %402, %401 : vector<1x128xf32>
    %404 = arith.divf %402, %403 : vector<1x128xf32>
    %c0_369 = arith.constant 0 : index
    %c0_370 = arith.constant 0 : index
    %405 = vector.load %arg17[%c0_369, %c0_370] : memref<1x128xf32, #tpu.memory_space<vmem>>, vector<1x128xf32>
    tpu.vector_store %arg17[%c0_369, %c0_370], %404 {strides = array<i32>} : memref<1x128xf32, #tpu.memory_space<vmem>>, vector<1x128xf32>,
    return
  }
}

</mosaic_0001>

<bundles_post_ra>
// kernel: gated_graph_model_forward.1
= control target key start
LH: loop header
LB: loop body
LE: loop exit
PB: predicated region body
PF: predicated region fallthrough
CT: control target
= control target key end

     0   :  { %vm84_vm0 = vcmask 261120   ;;  %vm182_vm1 = vcmask 392192   ;;  %s2864_s4 = inlined_call_operand.vmem [shape: bf16[2,3,32,32], index: 4, kind: input, shape index: {}]   ;;  %s2865_s0 = inlined_call_operand.vmem [shape: f32[16,32], index: 0, kind: input, shape index: {}]   ;;  %s2866_s5 = inlined_call_operand.vmem [shape: f32[2,3,1,32], index: 5, kind: input, shape index: {}]   ;;  %s2867_s7 = inlined_call_operand.vmem [shape: bf16[2,3,32,32], index: 7, kind: input, shape index: {}]   ;;  %s2868_s1 = inlined_call_operand.vmem [shape: bf16[16,48], index: 1, kind: input, shape index: {}]   ;;  %s2869_s9 = inlined_call_operand.vmem [shape: f32[2,3,1,32], index: 9, kind: input, shape index: {}]   ;;  %s2870_s6 = inlined_call_operand.vmem [shape: bf16[2,3,32,32], index: 6, kind: input, shape index: {}]   ;;  %s2871_s8 = inlined_call_operand.vmem [shape: f32[2,3,1,32], index: 8, kind: input, shape index: {}]   ;;  %s2872_s11 = inlined_call_operand.vmem [shape: f32[1,64], index: 11, kind: input, shape index: {}]   ;;  %s2873_s10 = inlined_call_operand.vmem [shape: bf16[32,64], index: 10, kind: input, shape index: {}]   ;;  %s2874_s13 = inlined_call_operand.vmem [shape: f32[1,32], index: 13, kind: input, shape index: {}]   ;;  %s2875_s12 = inlined_call_operand.vmem [shape: bf16[64,32], index: 12, kind: input, shape index: {}]   ;;  %s2876_s3 = inlined_call_operand.vmem [shape: s32[1,128], index: 3, kind: input, shape index: {}]   ;;  %s2877_s2 = inlined_call_operand.vmem [shape: s32[1,128], index: 2, kind: input, shape index: {}]   ;;  %s2878_s14 = inlined_call_operand.vmem [shape: bf16[1,32], index: 14, kind: input, shape index: {}]   ;;  %s2879_s15 = inlined_call_operand.vmem [shape: bf16[1,32], index: 15, kind: input, shape index: {}]   ;;  %s2880_s16 = inlined_call_operand.<no memory space> [shape: f32[1,1], index: 16, kind: input, shape index: {}]   ;;  %s2881_s17 = inlined_call_operand.vmem [shape: f32[1,128], index: 17, kind: output, shape index: {}]  }
   0x1   :  { %2884 = sst [smem:[#allocation3_spill]] %s2864_s4  ;;  %v2008_v9 = vld [vmem:[%s2867_s7 + $0x8] sm:$0xff]  ;;  %v2302_v13 = vld [vmem:[%s2866_s5 + $0x2] ss:$0 sm:$0xff]  ;;  %v2307_v14 = vld [vmem:[%s2866_s5 + $0x1] ss:$0 sm:$0xff] }
   0x2   :  { %2885 = sst [smem:[#allocation4_spill]] %s2865_s0  ;;  %v2315_v20 = vld [vmem:[%s2866_s5] ss:$0 sm:$0xff]  ;;  %v2323_v27 = vld [vmem:[%s2867_s7 + $0x18] sm:$0xff]  ;;  %v2339_v31 = vld [vmem:[%s2867_s7 + $0x10] sm:$0xff] }
   0x3   :  { %s2886_s26 = sld [smem:[#allocation3_spill]]  ;;  %v2328_v29 = vld [vmem:[%s2868_s1] sm:$0xff]  ;;  %v2006_v32 = vld [vmem:[%s2870_s6 + $0x8] sm:$0xff]  ;;  %v2010_v33 = vld [vmem:[%s2870_s6 + $0x18] sm:$0xff] }
   0x4   :  { %s2887_s22 = sld [smem:[#allocation4_spill]]  ;;  %v2007_v30 = vld [vmem:[%s2867_s7] sm:$0xff]  ;;  %v2009_v35 = vld [vmem:[%s2870_s6 + $0x10] sm:$0xff]  ;;  %v2363_v36 = vld [vmem:[%s2870_s6 + $0x28] sm:$0xff] }
   0x5   :  { %v2005_v34 = vld [vmem:[%s2870_s6] sm:$0xff]  ;;  %v2368_v37 = vld [vmem:[%s2867_s7 + $0x28] sm:$0xff] }
   0x6   :  { %v2374_v38 = vld [vmem:[%s2870_s6 + $0x20] sm:$0xff] }
   0x7   :  { %v2382_v39 = vld [vmem:[%s2867_s7 + $0x20] sm:$0xff] }
   0x8   :  { %v2395_v43 = vld [vmem:[%s2869_s9] ss:$0 sm:$0xff]  ;;  %v2407_v49 = vld [vmem:[%s2869_s9 + $0x1] ss:$0 sm:$0xff] }
   0x9   :  { %v2246_v0 = vld [vmem:[%s2886_s26 + $0x28] sm:$0xff]  ;;  %v2002_v1 = vld [vmem:[%s2886_s26 + $0x18] sm:$0xff]  ;;  %v2254_v2 = vld [vmem:[%s2886_s26 + $0x20] sm:$0xff] }
   0xa   :  { %v2259_v3 = vld [vmem:[%s2886_s26 + $0x8] sm:$0xff]  ;;  %v2264_v4 = vld [vmem:[%s2886_s26 + $0x10] sm:$0xff]  ;;  %166 = vmatpush.bf16.msra.mxu2 %v2246_v0  ;;  %130 = vmatpush.bf16.msra.mxu1 %v2002_v1  ;;  %v2270_v5 = vld [vmem:[%s2887_s22] sm:$0xff] }
   0xb   :  { %v2275_v6 = vld [vmem:[%s2887_s22 + $0x8] sm:$0xff]  ;;  %94 = vmatpush.bf16.msra.mxu0 %v2259_v3  ;;  %v2281_v7 = vld [vmem:[%s2886_s26] sm:$0xff] }
   0xc   :  { %v2285_v8 = vpack.c.bf16 %v2275_v6, %v2270_v5  ;;  %v2400_v45 = vld [vmem:[%s2871_s8] ss:$0 sm:$0xff]  ;;  %v2412_v52 = vld [vmem:[%s2871_s8 + $0x1] ss:$0 sm:$0xff] }
   0xe   :  { %167 = vmatpush.bf16.msra.mxu2 %v2254_v2  ;;  %131 = vmatpush.bf16.msra.mxu1 %v2264_v4 }
   0xf   :  { %95 = vmatpush.bf16.msra.mxu0 %v2281_v7 }
  0x11   :  { %1716 = vmatmul.msk.bf16.vlgmr.msra.gmra.mxu2 %vm84_vm0, %v2285_v8  ;;  %1702 = vmatmul.msk.bf16.vlgmr.msra.gmra.mxu1 %vm84_vm0, %v2285_v8 }
  0x12   :  { %1688 = vmatmul.msk.bf16.vlgmr.msra.gmra.mxu0 %vm84_vm0, %v2285_v8  ;;  %264 = vmatpush.bf16.msrb.mxu1 %v2008_v9 }
  0x13   :  { %230 = vmatpush.bf16.msrb.mxu0 %v2006_v32  ;;  %300 = vmatpush.bf16.msrb.mxu2 %v2010_v33 }
  0x16   :  { %265 = vmatpush.bf16.msrb.mxu1 %v2007_v30 }
  0x17   :  { %231 = vmatpush.bf16.msrb.mxu0 %v2005_v34  ;;  %301 = vmatpush.bf16.msrb.mxu2 %v2009_v35 }
  0x1a   :  { %408 = vmatpush.bf16.msra.mxu1 %v2368_v37 }
  0x1b   :  { %520 = vmatpush.bf16.msra.mxu2 %v2259_v3  ;;  %372 = vmatpush.bf16.msra.mxu0 %v2363_v36 }
  0x1e   :  { %409 = vmatpush.bf16.msra.mxu1 %v2382_v39 }
  0x1f   :  { %521 = vmatpush.bf16.msra.mxu2 %v2281_v7  ;;  %373 = vmatpush.bf16.msra.mxu0 %v2374_v38 }
  0x21   :  { %1739 = vmatmul.msk.bf16.vlgmr.msrb.gmra.mxu1 %vm84_vm0, %v2285_v8 }
  0x31   :  { %1795 = vmatmul.msk.bf16.vlgmr.msra.gmra.mxu1 %vm84_vm0, %v2285_v8 }
  0x8e   :  { %v133_v10 = vpop.f32.mrf.mxu1 }
  0x8f   :  { %v97_v12 = vpop.f32.mrf.mxu0  ;;  %v134_v19 = vadd.f32 %v2307_v14, %v133_v10 }
  0x90   :  { %v98_v24 = vadd.f32 %v2315_v20, %v97_v12 }
  0x94   :  { %v169_v11 = vpop.f32.mrf.mxu2 }
  0x95   :  { %v170_v17 = vadd.f32 %v2302_v13, %v169_v11 }
  0x96   :  { %v135_v15 = vpop.f32.mrf.mxu1 }
  0x97   :  { %v136_v21 = vadd.f32 %v2307_v14, %v135_v15  ;;  %v99_v23 = vpop.f32.mrf.mxu0 }
  0x98   :  { %v100_v25 = vadd.f32 %v2315_v20, %v99_v23 }
  0x99   :  { %v175_v26 = vpack.c.bf16 %v136_v21, %v134_v19 }
  0x9a   :  { %v174_v28 = vpack.c.bf16 %v100_v25, %v98_v24 }
  0x9c   :  { %v171_v16 = vpop.f32.mrf.mxu2 }
  0x9d   :  { %v172_v18 = vadd.f32 %v2302_v13, %v171_v16 }
  0x9e   :  { %v267_v44 = vpop.f32.mrf.mxu1 }
  0x9f   :  { %v176_v22 = vpack.c.bf16 %v172_v18, %v170_v17  ;;  %v268_v46 = vadd.f32 %v2395_v43, %v267_v44 }
  0xa1   :  { %191 = vmatpush.bf16.msra.mxu3 %v176_v22  ;;  %v2426_v22 = vld [vmem:[%s2869_s9 + $0x2] ss:$0 sm:$0xff] }
  0xa5   :  { %192 = vmatpush.bf16.msra.mxu3 %v175_v26 }
  0xa6   :  { %v269_v55 = vpop.f32.mrf.mxu1 }
  0xa7   :  { %v270_v59 = vadd.f32 %v2395_v43, %v269_v55 }
  0xa9   :  { %193 = vmatpush.bf16.msra.mxu3 %v174_v28 }
  0xac   :  { %1721 = vmatmul.msk.bf16.vlgmr.msra.gmra.mxu3 %vm182_vm1, %v2328_v29 }
  0xad   :  { %336 = vmatpush.bf16.msrb.mxu3 %v2323_v27 }
  0xae   :  { %v411_v19 = vpop.f32.mrf.mxu1 }
  0xb1   :  { %337 = vmatpush.bf16.msrb.mxu3 %v2339_v31 }
  0xb5   :  { %534 = vmatpush.bf16.msra.mxu3 %v2002_v1 }
  0xb9   :  { %535 = vmatpush.bf16.msra.mxu3 %v2264_v4 }
  0xbc   :  { %1767 = vmatmul.msk.bf16.vlgmr.msrb.gmra.mxu3 %vm84_vm0, %v2285_v8 }
  0xbd   :  { %597 = vmatpush.bf16.msrb.mxu3 %v2008_v9 }
  0xc1   :  { %598 = vmatpush.bf16.msrb.mxu3 %v2007_v30 }
 0x12f   :  { %v195_v40 = vpop.f32.mrf.mxu3 }
 0x137   :  { %v197_v41 = vpop.f32.mrf.mxu3 }
 0x138   :  { %v200_v42 = vpack.c.bf16 %v197_v41, %v195_v40  ;;  %v412_v40 = vadd.f32 %v2426_v22, %v411_v19 }
 0x13a   :  { %1730 = vmatmul.msk.bf16.vlgmr.msrb.gmra.mxu0 %vm84_vm0, %v200_v42  ;;  %1753 = vmatmul.msk.bf16.vlgmr.msrb.gmra.mxu2 %vm84_vm0, %v200_v42 }
 0x13b   :  { %548 = vmatpush.bf16.msrb.mxu0 %v2246_v0  ;;  %583 = vmatpush.bf16.msrb.mxu2 %v2006_v32 }
 0x13f   :  { %549 = vmatpush.bf16.msrb.mxu0 %v2254_v2  ;;  %584 = vmatpush.bf16.msrb.mxu2 %v2005_v34  ;;  %v339_v50 = vpop.f32.mrf.mxu3 }
 0x140   :  { %v340_v54 = vadd.f32 %v2407_v49, %v339_v50 }
 0x147   :  { %v341_v0 = vpop.f32.mrf.mxu3 }
 0x148   :  { %v342_v7 = vadd.f32 %v2407_v49, %v341_v0 }
 0x14a   :  { %1781 = vmatmul.msk.bf16.vlgmr.msra.gmra.mxu0 %vm84_vm0, %v200_v42 }
 0x14b   :  { %611 = vmatpush.bf16.msra.mxu0 %v2010_v33 }
 0x14f   :  { %612 = vmatpush.bf16.msra.mxu0 %v2009_v35 }
 0x1b7   :  { %v233_v47 = vpop.f32.mrf.mxu0 }
 0x1b8   :  { %v234_v48 = vadd.f32 %v2400_v45, %v233_v47  ;;  %v2436_v47 = vld [vmem:[%s2871_s8 + $0x2] ss:$0 sm:$0xff] }
 0x1ba   :  { %v416_v51 = vadd.f32 %v268_v46, %v234_v48 }
 0x1bc   :  { %v1796_v53 = vmul.f32 -1.442695, %v416_v51 }
 0x1bd   :  { %v303_v56 = vpop.f32.mrf.mxu2 }
 0x1be   :  { %2066 = vpow2.f32 %v1796_v53  ;;  %v304_v57 = vadd.f32 %v2412_v52, %v303_v56 }
 0x1bf   :  { %v235_v58 = vpop.f32.mrf.mxu0 }
 0x1c0   :  { %v456_v60 = vadd.f32 %v340_v54, %v304_v57  ;;  %v236_v61 = vadd.f32 %v2400_v45, %v235_v58  ;;  %v413_v54 = vpop.f32.mrf.mxu1 }
 0x1c2   :  { %v1798_v62 = vmul.f32 -1.442695, %v456_v60  ;;  %v417_v63 = vadd.f32 %v270_v59, %v236_v61 }
 0x1c4   :  { %v2067_v1 = vpop.eup %2066  ;;  %2068 = vpow2.f32 %v1798_v62  ;;  %v1797_v2 = vmul.f32 -1.442695, %v417_v63  ;;  %v414_v62 = vadd.f32 %v2426_v22, %v413_v54 }
 0x1c5   :  { %v424_v3 = vadd.f32 1.0, %v2067_v1  ;;  %v305_v4 = vpop.f32.mrf.mxu2 }
 0x1c6   :  { %2070 = vpow2.f32 %v1797_v2  ;;  %v306_v8 = vadd.f32 %v2412_v52, %v305_v4 }
 0x1c7   :  { %2072 = vrcp.f32 %v424_v3  ;;  %v437_v23 = vand.u32 2147483648, %v424_v3  ;;  %v435_v26 = vand.u32 2147483647, %v424_v3  ;;  %v375_v33 = vpop.f32.mrf.mxu0  ;;  %vm431_vm3 = vweird.f32 %v424_v3 }
 0x1c8   :  { %v457_v9 = vadd.f32 %v342_v7, %v306_v8  ;;  %v376_v58 = vadd.f32 %v2436_v47, %v375_v33 }
 0x1c9   :  { %v438_v41 = vor.u32 1.1754944e-38, %v437_v23  ;;  %vm436_vm5 = vcmp.eq.f32.partialorder %v435_v26, 8.507059e+37 }
 0x1ca   :  { %v2069_v10 = vpop.eup %2068  ;;  %v1799_v11 = vmul.f32 -1.442695, %v457_v9 }
 0x1cb   :  { %v2420_v12 = vadd.f32 1.0, %v2069_v10 }
 0x1cc   :  { %v2071_v15 = vpop.eup %2070  ;;  %2074 = vpow2.f32 %v1799_v11 }
 0x1cd   :  { %v2073_v16 = vpop.eup %2072  ;;  %2076 = vrcp.f32 %v2420_v12  ;;  %v425_v17 = vadd.f32 1.0, %v2071_v15  ;;  %vm471_vm10 = vweird.f32 %v2420_v12  ;;  %v477_v4 = vand.u32 2147483648, %v2420_v12 }
 0x1ce   :  { %v427_v18 = vmul.f32 %v2073_v16, %v424_v3  ;;  %vm432_vm2 = vweird.f32 %v2073_v16  ;;  %v475_v9 = vand.u32 2147483647, %v2420_v12 }
 0x1cf   :  { %2078 = vrcp.f32 %v425_v17  ;;  %vm433_vm4 = vmor %vm431_vm3, %vm432_vm2  ;;  %v452_v56 = vand.u32 2147483648, %v425_v17  ;;  %v450_v59 = vand.u32 2147483647, %v425_v17  ;;  %vm446_vm7 = vweird.f32 %v425_v17  ;;  %v377_v2 = vpop.f32.mrf.mxu0 }
 0x1d0   :  { %v428_v21 = vsub.f32 1.0, %v427_v18  ;;  %v478_v23 = vor.u32 1.1754944e-38, %v477_v4  ;;  %vm476_vm2 = vcmp.eq.f32.partialorder %v475_v9, 8.507059e+37 }
 0x1d1   :  { %v453_v3 = vor.u32 1.1754944e-38, %v452_v56  ;;  %vm451_vm11 = vcmp.eq.f32.partialorder %v450_v59, 8.507059e+37 }
 0x1d2   :  { %v2075_v24 = vpop.eup %2074  ;;  %v429_v25 = vmul.f32 %v2073_v16, %v428_v21 }
 0x1d3   :  { %v2428_v28 = vpop.eup %2076  ;;  %v465_v30 = vadd.f32 1.0, %v2075_v24 }
 0x1d4   :  { %v467_v32 = vmul.f32 %v2428_v28, %v2420_v12  ;;  %v430_v34 = vadd.f32 %v2073_v16, %v429_v25  ;;  %vm472_vm8 = vweird.f32 %v2428_v28 }
 0x1d5   :  { %v2079_v35 = vpop.eup %2078  ;;  %2080 = vrcp.f32 %v465_v30  ;;  %vm2446_vm13 = vmor %vm471_vm10, %vm472_vm8  ;;  %v492_v15 = vand.u32 2147483648, %v465_v30  ;;  %vm486_vm14 = vweird.f32 %v465_v30  ;;  %v490_v21 = vand.u32 2147483647, %v465_v30 }
 0x1d6   :  { %v468_v42 = vsub.f32 1.0, %v467_v32  ;;  %v434_v44 = vsel %vm433_vm4, %v2073_v16, %v430_v34  ;;  %v442_v46 = vmul.f32 %v2079_v35, %v425_v17  ;;  %vm447_vm6 = vweird.f32 %v2079_v35 }
 0x1d7   :  { %v439_v48 = vsel %vm436_vm5, %v438_v41, %v434_v44  ;;  %vm448_vm9 = vmor %vm446_vm7, %vm447_vm6  ;;  %v378_v16 = vadd.f32 %v2436_v47, %v377_v2  ;;  %v493_v25 = vor.u32 1.1754944e-38, %v492_v15  ;;  %vm491_vm3 = vcmp.eq.f32.partialorder %v490_v21, 8.507059e+37 }
 0x1d8   :  { %v443_v50 = vsub.f32 1.0, %v442_v46  ;;  %v496_v51 = vmul.f32 %v439_v48, %v412_v40  ;;  %v469_v53 = vmul.f32 %v2428_v28, %v468_v42 }
 0x1da   :  { %v444_v55 = vmul.f32 %v2079_v35, %v443_v50  ;;  %v498_v61 = vadd.f32 %v496_v51, %v376_v58  ;;  %v470_v1 = vadd.f32 %v2428_v28, %v469_v53 }
 0x1db   :  { %v2081_v57 = vpop.eup %2080 }
 0x1dc   :  { %v482_v60 = vmul.f32 %v2081_v57, %v465_v30  ;;  %v445_v63 = vadd.f32 %v2079_v35, %v444_v55  ;;  %vm487_vm12 = vweird.f32 %v2081_v57  ;;  %2082 = vtanh.f32 %v498_v61 }
 0x1dd   :  { %v474_v18 = vsel %vm2446_vm13, %v2428_v28, %v470_v1  ;;  %vm488_vm15 = vmor %vm486_vm14, %vm487_vm12 }
 0x1de   :  { %v483_v0 = vsub.f32 1.0, %v482_v60  ;;  %v449_v7 = vsel %vm448_vm9, %v2079_v35, %v445_v63  ;;  %v479_v26 = vsel %vm476_vm2, %v478_v23, %v474_v18 }
 0x1df   :  { %v454_v10 = vsel %vm451_vm11, %v453_v3, %v449_v7  ;;  %v502_v34 = vsub.f32 1.0, %v479_v26  ;;  %v506_v42 = vmul.f32 %v479_v26, %v2270_v5 }
 0x1e0   :  { %v484_v8 = vmul.f32 %v2081_v57, %v483_v0  ;;  %v497_v17 = vmul.f32 %v454_v10, %v414_v62 }
 0x1e2   :  { %v485_v19 = vadd.f32 %v2081_v57, %v484_v8  ;;  %v499_v12 = vadd.f32 %v497_v17, %v378_v16  ;;  %v2083_v32 = vpop.eup %2082 }
 0x1e3   :  { %v504_v35 = vmul.f32 %v2083_v32, %v502_v34  ;;  %v2514_v34 = vld [vmem:[%s2886_s26 + $0x58] sm:$0xff] }
 0x1e4   :  { %v489_v24 = vsel %vm488_vm15, %v2081_v57, %v485_v19  ;;  %2084 = vtanh.f32 %v499_v12 }
 0x1e5   :  { %v494_v33 = vsel %vm491_vm3, %v493_v25, %v489_v24  ;;  %v2456_v44 = vadd.f32 %v506_v42, %v504_v35 }
 0x1e6   :  { %v503_v40 = vsub.f32 1.0, %v494_v33  ;;  %v507_v30 = vmul.f32 %v494_v33, %v2275_v6 }
 0x1ea   :  { %v2085_v41 = vpop.eup %2084 }
 0x1eb   :  { %v505_v28 = vmul.f32 %v2085_v41, %v503_v40 }
 0x1ed   :  { %v2458_v46 = vadd.f32 %v507_v30, %v505_v28  ;;  %v2527_v30 = vld [vmem:[%s2886_s26 + $0x30] sm:$0xff] }
 0x1ef   :  { %v510_v48 = vpack.c.bf16 %v2458_v46, %v2456_v44 }
 0x1f1   :  { %1800 = vmatmul.msk.bf16.vlgmr.msra.gmra.mxu2 %vm84_vm0, %v510_v48  ;;  %1801 = vmatmul.msk.bf16.vlgmr.msra.gmra.mxu3 %vm84_vm0, %v510_v48 }
 0x1f2   :  { %1802 = vmatmul.msk.bf16.vlgmr.msrb.gmra.mxu0 %vm84_vm0, %v510_v48  ;;  %653 = vmatpush.bf16.msra.mxu3 %v2368_v37 }
 0x1f3   :  { %639 = vmatpush.bf16.msra.mxu2 %v2363_v36 }
 0x1f6   :  { %654 = vmatpush.bf16.msra.mxu3 %v2382_v39 }
 0x1f7   :  { %640 = vmatpush.bf16.msra.mxu2 %v2374_v38 }
 0x201   :  { %1805 = vmatmul.msk.bf16.vlgmr.msrb.gmra.mxu3 %vm84_vm0, %v510_v48 }
 0x211   :  { %1809 = vmatmul.msk.bf16.vlgmr.msra.gmra.mxu3 %vm84_vm0, %v510_v48 }
 0x26f   :  { %v551_v5 = vpop.f32.mrf.mxu0 }
 0x270   :  { %v552_v53 = vadd.f32 %v2302_v13, %v551_v5 }
 0x274   :  { %v523_v6 = vpop.f32.mrf.mxu2  ;;  %v537_v50 = vpop.f32.mrf.mxu3 }
 0x275   :  { %v538_v39 = vadd.f32 %v2307_v14, %v537_v50  ;;  %v524_v58 = vadd.f32 %v2315_v20, %v523_v6  ;;  %v2539_v50 = vld [vmem:[%s2886_s26 + $0x50] sm:$0xff] }
 0x277   :  { %v553_v51 = vpop.f32.mrf.mxu0 }
 0x278   :  { %v554_v54 = vadd.f32 %v2302_v13, %v553_v51 }
 0x27a   :  { %v558_v55 = vpack.c.bf16 %v554_v54, %v552_v53 }
 0x27c   :  { %564 = vmatpush.bf16.msrb.mxu1 %v558_v55  ;;  %v525_v37 = vpop.f32.mrf.mxu2  ;;  %v539_v36 = vpop.f32.mrf.mxu3 }
 0x27d   :  { %v540_v38 = vadd.f32 %v2307_v14, %v539_v36  ;;  %v526_v56 = vadd.f32 %v2315_v20, %v525_v37 }
 0x27f   :  { %v557_v57 = vpack.c.bf16 %v540_v38, %v538_v39  ;;  %v556_v59 = vpack.c.bf16 %v526_v56, %v524_v58  ;;  %v2549_v56 = vld [vmem:[%s2867_s7 + $0x38] sm:$0xff] }
 0x281   :  { %565 = vmatpush.bf16.msrb.mxu1 %v557_v57 }
 0x284   :  { %v600_v63 = vpop.f32.mrf.mxu3 }
 0x285   :  { %566 = vmatpush.bf16.msrb.mxu1 %v556_v59  ;;  %v601_v3 = vadd.f32 %v2395_v43, %v600_v63 }
 0x288   :  { %1803 = vmatmul.msk.bf16.vlgmr.msrb.gmra.mxu1 %vm182_vm1, %v2328_v29 }
 0x289   :  { %625 = vmatpush.bf16.msra.mxu1 %v2323_v27 }
 0x28c   :  { %v602_v16 = vpop.f32.mrf.mxu3 }
 0x28d   :  { %626 = vmatpush.bf16.msra.mxu1 %v2339_v31  ;;  %v603_v21 = vadd.f32 %v2395_v43, %v602_v16  ;;  %v2504_v43 = vld [vmem:[%s2886_s26 + $0x38] sm:$0xff] }
 0x28e   :  { %789 = vmatpush.bf16.msrb.mxu0 %v2504_v43 }
 0x292   :  { %790 = vmatpush.bf16.msrb.mxu0 %v2527_v30 }
 0x294   :  { %v656_v51 = vpop.f32.mrf.mxu3 }
 0x295   :  { %v657_v59 = vadd.f32 %v2426_v22, %v656_v51 }
 0x298   :  { %1807 = vmatmul.msk.bf16.vlgmr.msra.gmra.mxu1 %vm84_vm0, %v510_v48  ;;  %v2532_v48 = vld [vmem:[%s2886_s26 + $0x40] sm:$0xff] }
 0x305   :  { %v568_v13 = vpop.f32.mrf.mxu1 }
 0x30d   :  { %v570_v60 = vpop.f32.mrf.mxu1 }
 0x30e   :  { %v573_v14 = vpack.c.bf16 %v570_v60, %v568_v13 }
 0x310   :  { %1804 = vmatmul.msk.bf16.vlgmr.msrb.gmra.mxu2 %vm84_vm0, %v573_v14  ;;  %1806 = vmatmul.msk.bf16.vlgmr.msra.gmra.mxu0 %vm84_vm0, %v573_v14 }
 0x311   :  { %861 = vmatpush.bf16.msrb.mxu2 %v2514_v34 }
 0x315   :  { %v628_v20 = vpop.f32.mrf.mxu1  ;;  %862 = vmatpush.bf16.msrb.mxu2 %v2539_v50 }
 0x316   :  { %v629_v27 = vadd.f32 %v2407_v49, %v628_v20 }
 0x31d   :  { %v630_v1 = vpop.f32.mrf.mxu1 }
 0x31e   :  { %v631_v8 = vadd.f32 %v2407_v49, %v630_v1 }
 0x320   :  { %1808 = vmatmul.msk.bf16.vlgmr.msra.gmra.mxu2 %vm84_vm0, %v573_v14  ;;  %v2557_v14 = vld [vmem:[%s2867_s7 + $0x30] sm:$0xff] }
 0x38d   :  { %v614_v61 = vpop.f32.mrf.mxu0 }
 0x38e   :  { %v615_v62 = vadd.f32 %v2412_v52, %v614_v61 }
 0x390   :  { %v701_v0 = vadd.f32 %v629_v27, %v615_v62 }
 0x392   :  { %v1812_v31 = vmul.f32 -1.442695, %v701_v0 }
 0x393   :  { %v586_v2 = vpop.f32.mrf.mxu2 }
 0x394   :  { %2086 = vpow2.f32 %v1812_v31  ;;  %v587_v4 = vadd.f32 %v2400_v45, %v586_v2 }
 0x395   :  { %v616_v7 = vpop.f32.mrf.mxu0 }
 0x396   :  { %v661_v9 = vadd.f32 %v601_v3, %v587_v4  ;;  %v617_v10 = vadd.f32 %v2412_v52, %v616_v7  ;;  %v658_v4 = vpop.f32.mrf.mxu3 }
 0x398   :  { %v1810_v11 = vmul.f32 -1.442695, %v661_v9  ;;  %v702_v15 = vadd.f32 %v631_v8, %v617_v10 }
 0x39a   :  { %v2087_v17 = vpop.eup %2086  ;;  %2088 = vpow2.f32 %v1810_v11  ;;  %v1813_v18 = vmul.f32 -1.442695, %v702_v15 }
 0x39b   :  { %v588_v19 = vpop.f32.mrf.mxu2  ;;  %v2493_v12 = vadd.f32 1.0, %v2087_v17  ;;  %v659_v17 = vadd.f32 %v2426_v22, %v658_v4 }
 0x39c   :  { %2090 = vpow2.f32 %v1813_v18  ;;  %v589_v23 = vadd.f32 %v2400_v45, %v588_v19  ;;  %v2509_v45 = vld [vmem:[%s2886_s26 + $0x48] sm:$0xff] }
 0x39d   :  { %2092 = vrcp.f32 %v2493_v12  ;;  %825 = vmatpush.bf16.msrb.mxu1 %v2509_v45  ;;  %v722_v9 = vand.u32 2147483648, %v2493_v12  ;;  %vm716_vm11 = vweird.f32 %v2493_v12  ;;  %v720_v11 = vand.u32 2147483647, %v2493_v12 }
 0x39e   :  { %v662_v24 = vadd.f32 %v603_v21, %v589_v23 }
 0x39f   :  { %vm721_vm3 = vcmp.eq.f32.partialorder %v720_v11, 8.507059e+37 }
 0x3a0   :  { %v2089_v25 = vpop.eup %2088  ;;  %v1811_v49 = vmul.f32 -1.442695, %v662_v24 }
 0x3a1   :  { %v669_v52 = vadd.f32 1.0, %v2089_v25  ;;  %826 = vmatpush.bf16.msrb.mxu1 %v2532_v48  ;;  %v723_v25 = vor.u32 1.1754944e-38, %v722_v9  ;;  %v2645_v9 = vld [vmem:[%s2867_s7 + $0x40] sm:$0xff] }
 0x3a2   :  { %v2091_v26 = vpop.eup %2090  ;;  %2094 = vpow2.f32 %v1811_v49 }
 0x3a3   :  { %2096 = vrcp.f32 %v669_v52  ;;  %v2496_v32 = vadd.f32 1.0, %v2091_v26  ;;  %v2499_v33 = vpop.eup %2092  ;;  %v682_v53 = vand.u32 2147483648, %v669_v52  ;;  %v680_v55 = vand.u32 2147483647, %v669_v52  ;;  %v642_v39 = vpop.f32.mrf.mxu2 }
 0x3a4   :  { %v712_v28 = vmul.f32 %v2499_v33, %v2493_v12  ;;  %vm676_vm5 = vweird.f32 %v669_v52  ;;  %v643_v62 = vadd.f32 %v2436_v47, %v642_v39  ;;  %vm717_vm9 = vweird.f32 %v2499_v33  ;;  %v2597_v39 = vld [vmem:[%s2867_s7 + $0x58] sm:$0xff] }
 0x3a5   :  { %2098 = vrcp.f32 %v2496_v32  ;;  %v683_v58 = vor.u32 1.1754944e-38, %v682_v53  ;;  %vm681_vm7 = vcmp.eq.f32.partialorder %v680_v55, 8.507059e+37  ;;  %954 = vmatpush.bf16.msra.mxu1 %v2549_v56  ;;  %vm2572_vm13 = vmor %vm716_vm11, %vm717_vm9  ;;  %v737_v12 = vand.u32 2147483648, %v2496_v32 }
 0x3a6   :  { %v713_v37 = vsub.f32 1.0, %v712_v28  ;;  %vm731_vm2 = vweird.f32 %v2496_v32 }
 0x3a8   :  { %v2095_v35 = vpop.eup %2094  ;;  %v714_v20 = vmul.f32 %v2499_v33, %v713_v37 }
 0x3a9   :  { %v2097_v40 = vpop.eup %2096  ;;  %v2516_v41 = vadd.f32 1.0, %v2095_v35  ;;  %955 = vmatpush.bf16.msra.mxu1 %v2557_v14 }
 0x3aa   :  { %v672_v42 = vmul.f32 %v2097_v40, %v669_v52  ;;  %vm677_vm4 = vweird.f32 %v2097_v40  ;;  %v715_v8 = vadd.f32 %v2499_v33, %v714_v20  ;;  %v735_v52 = vand.u32 2147483647, %v2496_v32  ;;  %v2623_v20 = vld [vmem:[%s2866_s5 + $0x4] ss:$0 sm:$0xff] }
 0x3ab   :  { %2100 = vrcp.f32 %v2516_v41  ;;  %v2534_v5 = vpop.eup %2098  ;;  %vm678_vm6 = vmor %vm676_vm5, %vm677_vm4  ;;  %v697_v31 = vand.u32 2147483648, %v2516_v41  ;;  %v695_v3 = vand.u32 2147483647, %v2516_v41  ;;  %vm691_vm10 = vweird.f32 %v2516_v41  ;;  %v644_v15 = vpop.f32.mrf.mxu2 }
 0x3ac   :  { %v673_v6 = vsub.f32 1.0, %v672_v42  ;;  %v727_v36 = vmul.f32 %v2534_v5, %v2496_v32  ;;  %v719_v21 = vsel %vm2572_vm13, %v2499_v33, %v715_v8  ;;  %vm732_vm15 = vweird.f32 %v2534_v5 }
 0x3ad   :  { %v698_v16 = vor.u32 1.1754944e-38, %v697_v31  ;;  %vm696_vm14 = vcmp.eq.f32.partialorder %v695_v3, 8.507059e+37  ;;  %v645_v22 = vadd.f32 %v2436_v47, %v644_v15  ;;  %v724_v26 = vsel %vm721_vm3, %v723_v25, %v719_v21  ;;  %vm733_vm4 = vmor %vm731_vm2, %vm732_vm15  ;;  %v2631_v31 = vld [vmem:[%s2866_s5 + $0x3] ss:$0 sm:$0xff]  ;;  %v2701_v21 = vld [vmem:[%s2869_s9 + $0x4] ss:$0 sm:$0xff] }
 0x3ae   :  { %v674_v54 = vmul.f32 %v2097_v40, %v673_v6  ;;  %v728_v61 = vsub.f32 1.0, %v727_v36  ;;  %v747_v42 = vsub.f32 1.0, %v724_v26  ;;  %vm736_vm5 = vcmp.eq.f32.partialorder %v735_v52, 8.507059e+37 }
 0x3af   :  { %v751_v47 = vmul.f32 %v724_v26, %v2456_v44 }
 0x3b0   :  { %v675_v38 = vadd.f32 %v2097_v40, %v674_v54  ;;  %v729_v7 = vmul.f32 %v2534_v5, %v728_v61 }
 0x3b1   :  { %v2101_v57 = vpop.eup %2100 }
 0x3b2   :  { %v679_v13 = vsel %vm678_vm6, %v2097_v40, %v675_v38  ;;  %v687_v60 = vmul.f32 %v2101_v57, %v2516_v41  ;;  %vm692_vm8 = vweird.f32 %v2101_v57  ;;  %v730_v24 = vadd.f32 %v2534_v5, %v729_v7  ;;  %v2639_v7 = vld [vmem:[%s2867_s7 + $0x48] sm:$0xff] }
 0x3b3   :  { %v684_v27 = vsel %vm681_vm7, %v683_v58, %v679_v13  ;;  %vm693_vm12 = vmor %vm691_vm10, %vm692_vm8  ;;  %v738_v41 = vor.u32 1.1754944e-38, %v737_v12 }
 0x3b4   :  { %v741_v63 = vmul.f32 %v684_v27, %v657_v59  ;;  %v688_v0 = vsub.f32 1.0, %v687_v60  ;;  %v734_v33 = vsel %vm733_vm4, %v2534_v5, %v730_v24  ;;  %v2618_v59 = vld [vmem:[%s2866_s5 + $0x5] ss:$0 sm:$0xff]  ;;  %v2706_v24 = vld [vmem:[%s2871_s8 + $0x4] ss:$0 sm:$0xff] }
 0x3b5   :  { %v739_v28 = vsel %vm736_vm5, %v738_v41, %v734_v33 }
 0x3b6   :  { %v743_v1 = vadd.f32 %v741_v63, %v643_v62  ;;  %v689_v2 = vmul.f32 %v2101_v57, %v688_v0  ;;  %v748_v51 = vsub.f32 1.0, %v739_v28  ;;  %v752_v32 = vmul.f32 %v739_v28, %v2458_v46  ;;  %v2610_v46 = vld [vmem:[%s2867_s7 + $0x50] sm:$0xff] }
 0x3b8   :  { %v690_v10 = vadd.f32 %v2101_v57, %v689_v2  ;;  %2102 = vtanh.f32 %v743_v1 }
 0x3ba   :  { %v694_v19 = vsel %vm693_vm12, %v2101_v57, %v690_v10  ;;  %v2024_v10 = vld [vmem:[%s2870_s6 + $0x38] sm:$0xff] }
 0x3bb   :  { %v699_v23 = vsel %vm696_vm14, %v698_v16, %v694_v19  ;;  %918 = vmatpush.bf16.msra.mxu0 %v2024_v10 }
 0x3bc   :  { %v742_v49 = vmul.f32 %v699_v23, %v659_v17  ;;  %v2694_v17 = vld [vmem:[%s2871_s8 + $0x3] ss:$0 sm:$0xff] }
 0x3be   :  { %v744_v35 = vadd.f32 %v742_v49, %v645_v22  ;;  %v2103_v40 = vpop.eup %2102 }
 0x3bf   :  { %v749_v6 = vmul.f32 %v2103_v40, %v747_v42 }
 0x3c0   :  { %2104 = vtanh.f32 %v744_v35 }
 0x3c1   :  { %v2587_v54 = vadd.f32 %v751_v47, %v749_v6 }
 0x3c3   :  { %v755_v5 = vmax.f32 %v2587_v54, 0.0 }
 0x3c6   :  { %v2105_v53 = vpop.eup %2104 }
 0x3c7   :  { %v750_v55 = vmul.f32 %v2105_v53, %v748_v51 }
 0x3c9   :  { %v2590_v37 = vadd.f32 %v752_v32, %v750_v55 }
 0x3cb   :  { %v756_v36 = vmax.f32 %v2590_v37, 0.0 }
 0x3cd   :  { %v757_v44 = vpack.c.bf16 %v756_v36, %v755_v5 }
 0x3cf   :  { %1827 = vmatmul.msk.bf16.vlgmr.msrb.gmra.mxu0 %vm84_vm0, %v757_v44  ;;  %1841 = vmatmul.msk.bf16.vlgmr.msrb.gmra.mxu1 %vm84_vm0, %v757_v44 }
 0x3d0   :  { %1855 = vmatmul.msk.bf16.vlgmr.msrb.gmra.mxu2 %vm84_vm0, %v757_v44  ;;  %1098 = vmatpush.bf16.msrb.mxu1 %v2597_v39 }
 0x3d4   :  { %1099 = vmatpush.bf16.msrb.mxu1 %v2610_v46 }
 0x3df   :  { %1884 = vmatmul.msk.bf16.vlgmr.msra.gmra.mxu1 %vm84_vm0, %v757_v44 }
 0x3ef   :  { %1940 = vmatmul.msk.bf16.vlgmr.msrb.gmra.mxu1 %vm84_vm0, %v757_v44 }
 0x44c   :  { %v828_v38 = vpop.f32.mrf.mxu1  ;;  %v792_v58 = vpop.f32.mrf.mxu0 }
 0x44d   :  { %v829_v1 = vadd.f32 %v2623_v20, %v828_v38  ;;  %v793_v4 = vadd.f32 %v2631_v31, %v792_v58 }
 0x453   :  { %v864_v57 = vpop.f32.mrf.mxu2 }
 0x454   :  { %v830_v13 = vpop.f32.mrf.mxu1  ;;  %v865_v61 = vadd.f32 %v2618_v59, %v864_v57  ;;  %v794_v0 = vpop.f32.mrf.mxu0 }
 0x455   :  { %v831_v62 = vadd.f32 %v2623_v20, %v830_v13  ;;  %v795_v2 = vadd.f32 %v2631_v31, %v794_v0  ;;  %v2720_v0 = vld [vmem:[%s2869_s9 + $0x5] ss:$0 sm:$0xff] }
 0x457   :  { %v870_v3 = vpack.c.bf16 %v831_v62, %v829_v1  ;;  %v869_v8 = vpack.c.bf16 %v795_v2, %v793_v4 }
 0x45b   :  { %v866_v60 = vpop.f32.mrf.mxu2 }
 0x45c   :  { %v867_v27 = vadd.f32 %v2618_v59, %v866_v60 }
 0x45e   :  { %v871_v63 = vpack.c.bf16 %v867_v27, %v865_v61 }
 0x460   :  { %877 = vmatpush.bf16.msrb.mxu3 %v871_v63 }
 0x464   :  { %878 = vmatpush.bf16.msrb.mxu3 %v870_v3 }
 0x468   :  { %879 = vmatpush.bf16.msrb.mxu3 %v869_v8 }
 0x46b   :  { %1856 = vmatmul.msk.bf16.vlgmr.msrb.gmra.mxu3 %vm182_vm1, %v2328_v29  ;;  %v2028_v29 = vld [vmem:[%s2870_s6 + $0x48] sm:$0xff] }
 0x46c   :  { %1026 = vmatpush.bf16.msra.mxu3 %v2639_v7  ;;  %990 = vmatpush.bf16.msra.mxu2 %v2028_v29 }
 0x470   :  { %1027 = vmatpush.bf16.msra.mxu3 %v2645_v9 }
 0x474   :  { %1224 = vmatpush.bf16.msrb.mxu3 %v2509_v45  ;;  %v2023_v45 = vld [vmem:[%s2870_s6 + $0x30] sm:$0xff] }
 0x475   :  { %919 = vmatpush.bf16.msra.mxu0 %v2023_v45 }
 0x478   :  { %1225 = vmatpush.bf16.msrb.mxu3 %v2532_v48  ;;  %v2027_v48 = vld [vmem:[%s2870_s6 + $0x40] sm:$0xff] }
 0x479   :  { %991 = vmatpush.bf16.msra.mxu2 %v2027_v48 }
 0x47b   :  { %1912 = vmatmul.msk.bf16.vlgmr.msra.gmra.mxu3 %vm84_vm0, %v757_v44 }
 0x47c   :  { %1287 = vmatpush.bf16.msra.mxu3 %v2549_v56  ;;  %v2672_v56 = vld [vmem:[%s2870_s6 + $0x58] sm:$0xff] }
 0x47d   :  { %1210 = vmatpush.bf16.msrb.mxu2 %v2504_v43  ;;  %1062 = vmatpush.bf16.msrb.mxu0 %v2672_v56  ;;  %v957_v43 = vpop.f32.mrf.mxu1 }
 0x480   :  { %1288 = vmatpush.bf16.msra.mxu3 %v2557_v14  ;;  %v2678_v14 = vld [vmem:[%s2870_s6 + $0x50] sm:$0xff] }
 0x481   :  { %1211 = vmatpush.bf16.msrb.mxu2 %v2527_v30  ;;  %1063 = vmatpush.bf16.msrb.mxu0 %v2678_v14  ;;  %v2689_v30 = vld [vmem:[%s2869_s9 + $0x3] ss:$0 sm:$0xff] }
 0x482   :  { %v958_v18 = vadd.f32 %v2689_v30, %v957_v43 }
 0x485   :  { %v959_v25 = vpop.f32.mrf.mxu1 }
 0x486   :  { %v960_v35 = vadd.f32 %v2689_v30, %v959_v25 }
 0x48d   :  { %v1101_v27 = vpop.f32.mrf.mxu1 }
 0x4ee   :  { %v881_v11 = vpop.f32.mrf.mxu3 }
 0x4f6   :  { %v883_v15 = vpop.f32.mrf.mxu3 }
 0x4f7   :  { %v886_v16 = vpack.c.bf16 %v883_v15, %v881_v11  ;;  %v1102_v15 = vadd.f32 %v2720_v0, %v1101_v27 }
 0x4f9   :  { %1870 = vmatmul.msk.bf16.vlgmr.msra.gmra.mxu0 %vm84_vm0, %v886_v16  ;;  %1898 = vmatmul.msk.bf16.vlgmr.msra.gmra.mxu2 %vm84_vm0, %v886_v16 }
 0x4fa   :  { %1238 = vmatpush.bf16.msra.mxu0 %v2514_v34  ;;  %1273 = vmatpush.bf16.msra.mxu2 %v2024_v10 }
 0x4fe   :  { %1239 = vmatpush.bf16.msra.mxu0 %v2539_v50  ;;  %1274 = vmatpush.bf16.msra.mxu2 %v2023_v45  ;;  %v1029_v19 = vpop.f32.mrf.mxu3 }
 0x4ff   :  { %v1030_v49 = vadd.f32 %v2701_v21, %v1029_v19 }
 0x506   :  { %v1031_v28 = vpop.f32.mrf.mxu3 }
 0x507   :  { %v1032_v55 = vadd.f32 %v2701_v21, %v1031_v28 }
 0x509   :  { %1926 = vmatmul.msk.bf16.vlgmr.msrb.gmra.mxu0 %vm84_vm0, %v886_v16 }
 0x50a   :  { %1301 = vmatpush.bf16.msrb.mxu0 %v2028_v29 }
 0x50e   :  { %1302 = vmatpush.bf16.msrb.mxu0 %v2027_v48 }
 0x576   :  { %v921_v34 = vpop.f32.mrf.mxu0 }
 0x577   :  { %v922_v50 = vadd.f32 %v2694_v17, %v921_v34  ;;  %v2727_v34 = vld [vmem:[%s2871_s8 + $0x5] ss:$0 sm:$0xff] }
 0x579   :  { %v1106_v23 = vadd.f32 %v958_v18, %v922_v50 }
 0x57b   :  { %v1941_v12 = vmul.f32 -1.442695, %v1106_v23  ;;  %v1103_v23 = vpop.f32.mrf.mxu1 }
 0x57c   :  { %v993_v22 = vpop.f32.mrf.mxu2 }
 0x57d   :  { %2106 = vpow2.f32 %v1941_v12  ;;  %v994_v52 = vadd.f32 %v2706_v24, %v993_v22 }
 0x57e   :  { %v923_v26 = vpop.f32.mrf.mxu0 }
 0x57f   :  { %v1146_v33 = vadd.f32 %v1030_v49, %v994_v52  ;;  %v924_v40 = vadd.f32 %v2694_v17, %v923_v26 }
 0x581   :  { %v1943_v41 = vmul.f32 -1.442695, %v1146_v33  ;;  %v1107_v42 = vadd.f32 %v960_v35, %v924_v40  ;;  %v1104_v40 = vadd.f32 %v2720_v0, %v1103_v23 }
 0x583   :  { %v2107_v6 = vpop.eup %2106  ;;  %2108 = vpow2.f32 %v1943_v41  ;;  %v1942_v47 = vmul.f32 -1.442695, %v1107_v42 }
 0x584   :  { %v1114_v51 = vadd.f32 1.0, %v2107_v6  ;;  %v995_v53 = vpop.f32.mrf.mxu2 }
 0x585   :  { %2110 = vpow2.f32 %v1942_v47  ;;  %v996_v32 = vadd.f32 %v2706_v24, %v995_v53 }
 0x586   :  { %2112 = vrcp.f32 %v1114_v51  ;;  %v1127_v1 = vand.u32 2147483648, %v1114_v51  ;;  %v1065_v3 = vpop.f32.mrf.mxu0  ;;  %v1125_v8 = vand.u32 2147483647, %v1114_v51  ;;  %vm1121_vm7 = vweird.f32 %v1114_v51 }
 0x587   :  { %v1147_v44 = vadd.f32 %v1032_v55, %v996_v32  ;;  %v1066_v52 = vadd.f32 %v2727_v34, %v1065_v3 }
 0x588   :  { %v1128_v16 = vor.u32 1.1754944e-38, %v1127_v1  ;;  %vm1126_vm9 = vcmp.eq.f32.partialorder %v1125_v8, 8.507059e+37 }
 0x589   :  { %v2109_v38 = vpop.eup %2108  ;;  %v1944_v57 = vmul.f32 -1.442695, %v1147_v44 }
 0x58a   :  { %v2714_v58 = vadd.f32 1.0, %v2109_v38 }
 0x58b   :  { %v2111_v13 = vpop.eup %2110  ;;  %2114 = vpow2.f32 %v1944_v57 }
 0x58c   :  { %v2113_v60 = vpop.eup %2112  ;;  %2116 = vrcp.f32 %v2714_v58  ;;  %v1115_v61 = vadd.f32 1.0, %v2111_v13  ;;  %vm1161_vm12 = vweird.f32 %v2714_v58  ;;  %v1167_v53 = vand.u32 2147483648, %v2714_v58 }
 0x58d   :  { %v1117_v62 = vmul.f32 %v2113_v60, %v1114_v51  ;;  %vm1122_vm6 = vweird.f32 %v2113_v60  ;;  %v1165_v38 = vand.u32 2147483647, %v2714_v58 }
 0x58e   :  { %2118 = vrcp.f32 %v1115_v61  ;;  %vm1123_vm8 = vmor %vm1121_vm7, %vm1122_vm6  ;;  %v1142_v49 = vand.u32 2147483648, %v1115_v61  ;;  %v1140_v35 = vand.u32 2147483647, %v1115_v61  ;;  %v1067_v28 = vpop.f32.mrf.mxu0  ;;  %vm1136_vm11 = vweird.f32 %v1115_v61 }
 0x58f   :  { %v1118_v63 = vsub.f32 1.0, %v1117_v62  ;;  %v1068_v57 = vadd.f32 %v2727_v34, %v1067_v28  ;;  %vm1166_vm5 = vcmp.eq.f32.partialorder %v1165_v38, 8.507059e+37 }
 0x590   :  { %v1143_v51 = vor.u32 1.1754944e-38, %v1142_v49  ;;  %vm1141_vm15 = vcmp.eq.f32.partialorder %v1140_v35, 8.507059e+37 }
 0x591   :  { %v2115_v2 = vpop.eup %2114  ;;  %v1119_v4 = vmul.f32 %v2113_v60, %v1118_v63  ;;  %v1168_v63 = vor.u32 1.1754944e-38, %v1167_v53 }
 0x592   :  { %v2117_v10 = vpop.eup %2116  ;;  %v1155_v29 = vadd.f32 1.0, %v2115_v2 }
 0x593   :  { %v1157_v45 = vmul.f32 %v2117_v10, %v2714_v58  ;;  %v1120_v48 = vadd.f32 %v2113_v60, %v1119_v4  ;;  %vm1162_vm13 = vweird.f32 %v2117_v10 }
 0x594   :  { %v2119_v11 = vpop.eup %2118  ;;  %2120 = vrcp.f32 %v1155_v29  ;;  %v1182_v44 = vand.u32 2147483648, %v1155_v29  ;;  %vm1163_vm2 = vmor %vm1161_vm12, %vm1162_vm13  ;;  %v1180_v62 = vand.u32 2147483647, %v1155_v29  ;;  %vm1176_vm4 = vweird.f32 %v1155_v29 }
 0x595   :  { %v1158_v43 = vsub.f32 1.0, %v1157_v45  ;;  %v1124_v18 = vsel %vm1123_vm8, %v2113_v60, %v1120_v48  ;;  %v1132_v50 = vmul.f32 %v2119_v11, %v1115_v61  ;;  %vm1137_vm10 = vweird.f32 %v2119_v11 }
 0x596   :  { %v1129_v19 = vsel %vm1126_vm9, %v1128_v16, %v1124_v18  ;;  %vm1138_vm14 = vmor %vm1136_vm11, %vm1137_vm10  ;;  %v1183_v8 = vor.u32 1.1754944e-38, %v1182_v44  ;;  %vm1181_vm7 = vcmp.eq.f32.partialorder %v1180_v62, 8.507059e+37 }
 0x597   :  { %v1186_v12 = vmul.f32 %v1129_v19, %v1102_v15  ;;  %v1133_v25 = vsub.f32 1.0, %v1132_v50  ;;  %v1159_v22 = vmul.f32 %v2117_v10, %v1158_v43 }
 0x599   :  { %v1134_v26 = vmul.f32 %v2119_v11, %v1133_v25  ;;  %v1188_v42 = vadd.f32 %v1186_v12, %v1066_v52  ;;  %v1160_v47 = vadd.f32 %v2117_v10, %v1159_v22 }
 0x59a   :  { %v2121_v33 = vpop.eup %2120 }
 0x59b   :  { %v1172_v41 = vmul.f32 %v2121_v33, %v1155_v29  ;;  %v1135_v6 = vadd.f32 %v2119_v11, %v1134_v26  ;;  %2122 = vtanh.f32 %v1188_v42  ;;  %vm1177_vm3 = vweird.f32 %v2121_v33 }
 0x59c   :  { %v1164_v27 = vsel %vm1163_vm2, %v2117_v10, %v1160_v47  ;;  %vm1178_vm6 = vmor %vm1176_vm4, %vm1177_vm3 }
 0x59d   :  { %v1173_v55 = vsub.f32 1.0, %v1172_v41  ;;  %v1139_v32 = vsel %vm1138_vm14, %v2119_v11, %v1135_v6  ;;  %v1169_v3 = vsel %vm1166_vm5, %v1168_v63, %v1164_v27 }
 0x59e   :  { %v1144_v13 = vsel %vm1141_vm15, %v1143_v51, %v1139_v32  ;;  %v1192_v48 = vsub.f32 1.0, %v1169_v3  ;;  %v1196_v10 = vmul.f32 %v1169_v3, %v755_v5 }
 0x59f   :  { %v1174_v60 = vmul.f32 %v2121_v33, %v1173_v55  ;;  %v1187_v61 = vmul.f32 %v1144_v13, %v1104_v40 }
 0x5a1   :  { %v1175_v1 = vadd.f32 %v2121_v33, %v1174_v60  ;;  %v1189_v2 = vadd.f32 %v1187_v61, %v1068_v57  ;;  %v2123_v58 = vpop.eup %2122 }
 0x5a2   :  { %v1194_v11 = vmul.f32 %v2123_v58, %v1192_v48 }
 0x5a3   :  { %v1179_v4 = vsel %vm1178_vm6, %v2121_v33, %v1175_v1  ;;  %2124 = vtanh.f32 %v1189_v2 }
 0x5a4   :  { %v1184_v45 = vsel %vm1181_vm7, %v1183_v8, %v1179_v4  ;;  %v2739_v18 = vadd.f32 %v1196_v10, %v1194_v11  ;;  %v2035_v10 = vld [vmem:[%s2873_s10] sm:$0xff] }
 0x5a5   :  { %v1193_v15 = vsub.f32 1.0, %v1184_v45  ;;  %v1197_v43 = vmul.f32 %v1184_v45, %v756_v36 }
 0x5a9   :  { %v2125_v16 = vpop.eup %2124 }
 0x5aa   :  { %v1195_v29 = vmul.f32 %v2125_v16, %v1193_v15 }
 0x5ac   :  { %v2741_v50 = vadd.f32 %v1197_v43, %v1195_v29 }
 0x5ae   :  { %v1200_v19 = vpack.c.bf16 %v2741_v50, %v2739_v18 }
 0x5b0   :  { %1945 = vmatmul.msk.bf16.vlgmr.msrb.gmra.mxu2 %vm84_vm0, %v1200_v19  ;;  %1946 = vmatmul.msk.bf16.vlgmr.msrb.gmra.mxu3 %vm84_vm0, %v1200_v19 }
 0x5b1   :  { %1947 = vmatmul.msk.bf16.vlgmr.msra.gmra.mxu0 %vm84_vm0, %v1200_v19  ;;  %1343 = vmatpush.bf16.msrb.mxu3 %v2597_v39 }
 0x5b2   :  { %1329 = vmatpush.bf16.msrb.mxu2 %v2672_v56 }
 0x5b5   :  { %1344 = vmatpush.bf16.msrb.mxu3 %v2610_v46 }
 0x5b6   :  { %1330 = vmatpush.bf16.msrb.mxu2 %v2678_v14 }
 0x5c0   :  { %1950 = vmatmul.msk.bf16.vlgmr.msra.gmra.mxu3 %vm84_vm0, %v1200_v19 }
 0x5d0   :  { %1954 = vmatmul.msk.bf16.vlgmr.msrb.gmra.mxu3 %vm84_vm0, %v1200_v19 }
 0x62e   :  { %v1241_v54 = vpop.f32.mrf.mxu0 }
 0x62f   :  { %v1242_v23 = vadd.f32 %v2618_v59, %v1241_v54 }
 0x633   :  { %v1213_v37 = vpop.f32.mrf.mxu2  ;;  %v1227_v5 = vpop.f32.mrf.mxu3 }
 0x634   :  { %v1228_v46 = vadd.f32 %v2623_v20, %v1227_v5  ;;  %v1214_v52 = vadd.f32 %v2631_v31, %v1213_v37 }
 0x636   :  { %v1243_v36 = vpop.f32.mrf.mxu0 }
 0x637   :  { %v1244_v12 = vadd.f32 %v2618_v59, %v1243_v36  ;;  %v2150_v59 = vld [vmem:[%s2868_s1] sm:$0xff] }
 0x639   :  { %v1248_v25 = vpack.c.bf16 %v1244_v12, %v1242_v23 }
 0x63b   :  { %1254 = vmatpush.bf16.msra.mxu1 %v1248_v25  ;;  %v1215_v39 = vpop.f32.mrf.mxu2  ;;  %v1229_v56 = vpop.f32.mrf.mxu3 }
 0x63c   :  { %v1230_v14 = vadd.f32 %v2623_v20, %v1229_v56  ;;  %v1216_v22 = vadd.f32 %v2631_v31, %v1215_v39 }
 0x63e   :  { %v1247_v49 = vpack.c.bf16 %v1230_v14, %v1228_v46  ;;  %v1246_v26 = vpack.c.bf16 %v1216_v22, %v1214_v52 }
 0x640   :  { %1255 = vmatpush.bf16.msra.mxu1 %v1247_v49 }
 0x643   :  { %v1290_v42 = vpop.f32.mrf.mxu3 }
 0x644   :  { %1256 = vmatpush.bf16.msra.mxu1 %v1246_v26  ;;  %v1291_v51 = vadd.f32 %v2689_v30, %v1290_v42 }
 0x647   :  { %1948 = vmatmul.msk.bf16.vlgmr.msra.gmra.mxu1 %vm182_vm1, %v2150_v59 }
 0x648   :  { %1315 = vmatpush.bf16.msrb.mxu1 %v2639_v7 }
 0x64b   :  { %v1292_v60 = vpop.f32.mrf.mxu3 }
 0x64c   :  { %1316 = vmatpush.bf16.msrb.mxu1 %v2645_v9  ;;  %v1293_v63 = vadd.f32 %v2689_v30, %v1292_v60  ;;  %v2036_v30 = vld [vmem:[%s2873_s10 + $0x8] sm:$0xff] }
 0x64d   :  { %1477 = vmatpush.bf16.msra.mxu0 %v2036_v30 }
 0x651   :  { %1478 = vmatpush.bf16.msra.mxu0 %v2035_v10 }
 0x657   :  { %1952 = vmatmul.msk.bf16.vlgmr.msrb.gmra.mxu1 %vm84_vm0, %v1200_v19  ;;  %v1346_v19 = vpop.f32.mrf.mxu3 }
 0x658   :  { %v1347_v46 = vadd.f32 %v2720_v0, %v1346_v19 }
 0x6c4   :  { %v1258_v20 = vpop.f32.mrf.mxu1 }
 0x6cc   :  { %v1260_v35 = vpop.f32.mrf.mxu1 }
 0x6cd   :  { %v1263_v33 = vpack.c.bf16 %v1260_v35, %v1258_v20 }
 0x6cf   :  { %1949 = vmatmul.msk.bf16.vlgmr.msra.gmra.mxu2 %vm84_vm0, %v1263_v33  ;;  %1951 = vmatmul.msk.bf16.vlgmr.msrb.gmra.mxu0 %vm84_vm0, %v1263_v33 }
 0x6d4   :  { %v1318_v31 = vpop.f32.mrf.mxu1 }
 0x6d5   :  { %v1319_v40 = vadd.f32 %v2701_v21, %v1318_v31 }
 0x6dc   :  { %v1320_v6 = vpop.f32.mrf.mxu1 }
 0x6dd   :  { %v1321_v32 = vadd.f32 %v2701_v21, %v1320_v6 }
 0x6df   :  { %1953 = vmatmul.msk.bf16.vlgmr.msrb.gmra.mxu2 %vm84_vm0, %v1263_v33 }
 0x74c   :  { %v1304_v7 = vpop.f32.mrf.mxu0 }
 0x74d   :  { %v1305_v41 = vadd.f32 %v2706_v24, %v1304_v7 }
 0x74f   :  { %v1391_v28 = vadd.f32 %v1319_v40, %v1305_v41  ;;  %v1348_v41 = vpop.f32.mrf.mxu3 }
 0x751   :  { %v1957_v9 = vmul.f32 -1.442695, %v1391_v28 }
 0x752   :  { %v1276_v47 = vpop.f32.mrf.mxu2 }
 0x753   :  { %2126 = vpow2.f32 %v1957_v9  ;;  %v1277_v53 = vadd.f32 %v2694_v17, %v1276_v47 }
 0x754   :  { %v1306_v55 = vpop.f32.mrf.mxu0 }
 0x755   :  { %v1351_v44 = vadd.f32 %v1291_v51, %v1277_v53  ;;  %v1307_v38 = vadd.f32 %v2706_v24, %v1306_v55  ;;  %v1349_v55 = vadd.f32 %v2720_v0, %v1348_v41  ;;  %v1545_v41 = vld [vmem:[%s2878_s14] sm:$0x1] }
 0x757   :  { %v1955_v57 = vmul.f32 -1.442695, %v1351_v44  ;;  %v1392_v13 = vadd.f32 %v1321_v32, %v1307_v38 }
 0x759   :  { %v2127_v61 = vpop.eup %2126  ;;  %2128 = vpow2.f32 %v1955_v57  ;;  %v1958_v27 = vmul.f32 -1.442695, %v1392_v13 }
 0x75a   :  { %v1278_v62 = vpop.f32.mrf.mxu2  ;;  %v2778_v2 = vadd.f32 1.0, %v2127_v61 }
 0x75b   :  { %2130 = vpow2.f32 %v1958_v27  ;;  %v1279_v1 = vadd.f32 %v2694_v17, %v1278_v62 }
 0x75c   :  { %2132 = vrcp.f32 %v2778_v2  ;;  %v1412_v9 = vand.u32 2147483648, %v2778_v2  ;;  %vm1406_vm14 = vweird.f32 %v2778_v2  ;;  %v1410_v47 = vand.u32 2147483647, %v2778_v2 }
 0x75d   :  { %v1352_v3 = vadd.f32 %v1293_v63, %v1279_v1 }
 0x75e   :  { %v1413_v61 = vor.u32 1.1754944e-38, %v1412_v9  ;;  %vm1411_vm6 = vcmp.eq.f32.partialorder %v1410_v47, 8.507059e+37  ;;  %v2152_v9 = vmov 0  }
 0x75f   :  { %v2129_v4 = vpop.eup %2128  ;;  %v1956_v21 = vmul.f32 -1.442695, %v1352_v3  ;;  %2043 = vset.pattern.permute.xlu0 %v2152_v9 }
 0x760   :  { %v1359_v24 = vadd.f32 1.0, %v2129_v4 }
 0x761   :  { %v2131_v8 = vpop.eup %2130  ;;  %2134 = vpow2.f32 %v1956_v21 }
 0x762   :  { %2136 = vrcp.f32 %v1359_v24  ;;  %v2781_v58 = vadd.f32 1.0, %v2131_v8  ;;  %v2784_v45 = vpop.eup %2132  ;;  %v1372_v54 = vand.u32 2147483648, %v1359_v24  ;;  %v1370_v5 = vand.u32 2147483647, %v1359_v24  ;;  %v1332_v12 = vpop.f32.mrf.mxu2 }
 0x763   :  { %v1402_v16 = vmul.f32 %v2784_v45, %v2778_v2  ;;  %vm1366_vm8 = vweird.f32 %v1359_v24  ;;  %v1333_v59 = vadd.f32 %v2727_v34, %v1332_v12  ;;  %vm1407_vm12 = vweird.f32 %v2784_v45 }
 0x764   :  { %2138 = vrcp.f32 %v2781_v58  ;;  %v1373_v56 = vor.u32 1.1754944e-38, %v1372_v54  ;;  %vm1371_vm10 = vcmp.eq.f32.partialorder %v1370_v5, 8.507059e+37  ;;  %vm2808_vm2 = vmor %vm1406_vm14, %vm1407_vm12  ;;  %v1427_v60 = vand.u32 2147483648, %v2781_v58  ;;  %v2062_v54 = vld [vmem:[%s2872_s11] ss:$0 sm:$0xff] }
 0x765   :  { %v1403_v36 = vsub.f32 1.0, %v1402_v16  ;;  %vm1421_vm5 = vweird.f32 %v2781_v58  ;;  %v1425_v62 = vand.u32 2147483647, %v2781_v58 }
 0x766   :  { %v1428_v4 = vor.u32 1.1754944e-38, %v1427_v60 }
 0x767   :  { %v2135_v17 = vpop.eup %2134  ;;  %v1404_v49 = vmul.f32 %v2784_v45, %v1403_v36 }
 0x768   :  { %v2137_v48 = vpop.eup %2136  ;;  %v1360_v11 = vadd.f32 1.0, %v2135_v17 }
 0x769   :  { %v1362_v15 = vmul.f32 %v2137_v48, %v1359_v24  ;;  %vm1367_vm1 = vweird.f32 %v2137_v48  ;;  %v1405_v28 = vadd.f32 %v2784_v45, %v1404_v49  ;;  %v2151_v49 = vmov 1.0  }
 0x76a   :  { %2140 = vrcp.f32 %v1360_v11  ;;  %v2794_v29 = vpop.eup %2138  ;;  %vm1368_vm9 = vmor %vm1366_vm8, %vm1367_vm1  ;;  %v1387_v33 = vand.u32 2147483648, %v1360_v11  ;;  %v1385_v40 = vand.u32 2147483647, %v1360_v11  ;;  %vm1381_vm13 = vweird.f32 %v1360_v11  ;;  %v1334_v51 = vpop.f32.mrf.mxu2 }
 0x76b   :  { %v1363_v43 = vsub.f32 1.0, %v1362_v15  ;;  %v1417_v23 = vmul.f32 %v2794_v29, %v2781_v58  ;;  %v1409_v38 = vsel %vm2808_vm2, %v2784_v45, %v1405_v28  ;;  %vm1422_vm4 = vweird.f32 %v2794_v29 }
 0x76c   :  { %v1388_v53 = vor.u32 1.1754944e-38, %v1387_v33  ;;  %vm1386_vm3 = vcmp.eq.f32.partialorder %v1385_v40, 8.507059e+37  ;;  %v1335_v0 = vadd.f32 %v2727_v34, %v1334_v51  ;;  %v1414_v63 = vsel %vm1411_vm6, %v1413_v61, %v1409_v38  ;;  %vm1423_vm7 = vmor %vm1421_vm5, %vm1422_vm4 }
 0x76d   :  { %v1364_v37 = vmul.f32 %v2137_v48, %v1363_v43  ;;  %v1418_v52 = vsub.f32 1.0, %v1417_v23  ;;  %v1437_v21 = vsub.f32 1.0, %v1414_v63  ;;  %vm1426_vm1 = vcmp.eq.f32.partialorder %v1425_v62, 8.507059e+37  ;;  %v2037_v43 = vld [vmem:[%s2875_s12] sm:$0xff] }
 0x76e   :  { %v1441_v34 = vmul.f32 %v1414_v63, %v2739_v18  ;;  %v2039_v18 = vld [vmem:[%s2875_s12 + $0x10] sm:$0xff]  ;;  %vm1524_vm8 = vcmask 523264   ;;  %v22_v28 = vstv %s2880_s16 }
 0x76f   :  { %v1365_v25 = vadd.f32 %v2137_v48, %v1364_v37  ;;  %v1419_v42 = vmul.f32 %v2794_v29, %v1418_v52  ;;  %23 = vst [vmem:[#allocation2] sm:$0x1] %v22_v28 }
 0x770   :  { %v2141_v39 = vpop.eup %2140 }
 0x771   :  { %v1369_v14 = vsel %vm1368_vm9, %v2137_v48, %v1365_v25  ;;  %v1377_v22 = vmul.f32 %v2141_v39, %v1360_v11  ;;  %vm1382_vm11 = vweird.f32 %v2141_v39  ;;  %v1420_v13 = vadd.f32 %v2794_v29, %v1419_v42  ;;  %v1565_v42 = vld [vmem:[%s2879_s15] sm:$0x1] }
 0x772   :  { %v1374_v26 = vsel %vm1371_vm10, %v1373_v56, %v1369_v14  ;;  %vm1383_vm15 = vmor %vm1381_vm13, %vm1382_vm11  ;;  %v2065_v14 = vld [vmem:[%s2877_s2] ss:$0 sm:$0xff]  ;;  %vm1601_vm13 = vcmask 130048  }
 0x773   :  { %v1431_v20 = vmul.f32 %v1374_v26, %v1347_v46  ;;  %v1378_v35 = vsub.f32 1.0, %v1377_v22  ;;  %v1424_v2 = vsel %vm1423_vm7, %v2794_v29, %v1420_v13  ;;  %v2040_v29 = vld [vmem:[%s2875_s12 + $0x18] sm:$0xff]  ;;  %v2064_v46 = vld [vmem:[%s2876_s3] ss:$0 sm:$0xff] }
 0x774   :  { %v1429_v24 = vsel %vm1426_vm1, %v1428_v4, %v1424_v2  ;;  %1532 = vmatpush.bf16.msra.mxu1 %v2040_v29  ;;  %v2063_v26 = vld [vmem:[%s2874_s13] ss:$0 sm:$0xff] }
 0x775   :  { %v1433_v31 = vadd.f32 %v1431_v20, %v1333_v59  ;;  %v1379_v7 = vmul.f32 %v2141_v39, %v1378_v35  ;;  %v1438_v45 = vsub.f32 1.0, %v1429_v24  ;;  %v1442_v58 = vmul.f32 %v1429_v24, %v2741_v50  ;;  %v2038_v50 = vld [vmem:[%s2875_s12 + $0x8] sm:$0xff] }
 0x777   :  { %v1380_v6 = vadd.f32 %v2141_v39, %v1379_v7  ;;  %2142 = vtanh.f32 %v1433_v31 }
 0x778   :  { %1533 = vmatpush.bf16.msra.mxu1 %v2039_v18 }
 0x779   :  { %v1384_v44 = vsel %vm1383_vm15, %v2141_v39, %v1380_v6  ;;  %v1582_v39 = vlaneseq  ;;  %v1648_v6 = vld [vmem:[#allocation2] sm:$0x1] }
 0x77a   :  { %v1389_v57 = vsel %vm1386_vm3, %v1388_v53, %v1384_v44  ;;  %1651 = vperm.xlu0 %2043, %v1648_v6  }
 0x77b   :  { %v1432_v27 = vmul.f32 %v1389_v57, %v1349_v55  ;;  %v1583_v56 = vshrl.u32 %v1582_v39, 7 }
 0x77c   :  { %1534 = vmatpush.bf16.msra.mxu1 %v2038_v50 }
 0x77d   :  { %v1434_v1 = vadd.f32 %v1432_v27, %v1335_v0  ;;  %v2143_v3 = vpop.eup %2142  ;;  %v1584_v22 = vadd.s32 8, %v1583_v56  ;;  %vm1595_vm11 = vcmp.eq.s32.totalorder %v1583_v56, %v2064_v46  ;;  %vm1587_vm12 = vcmp.eq.s32.totalorder %v1583_v56, %v2065_v14 }
 0x77e   :  { %v1439_v8 = vmul.f32 %v2143_v3, %v1437_v21 }
 0x77f   :  { %2144 = vtanh.f32 %v1434_v1  ;;  %vm1596_vm9 = vcmp.eq.s32.totalorder %v1584_v22, %v2064_v46  ;;  %vm1588_vm10 = vcmp.eq.s32.totalorder %v1584_v22, %v2065_v14 }
 0x780   :  { %v1443_v17 = vadd.f32 %v1441_v34, %v1439_v8  ;;  %1535 = vmatpush.bf16.msra.mxu1 %v2037_v43  ;;  %1991 = vmatpush.msk.msrb.mxu0 %vm1596_vm9, %v2151_v49 }
 0x782   :  { %v1445_v15 = vmax.f32 %v1443_v17, 0.0  ;;  %1992 = vmatpush.msk.msrb.mxu0 %vm1595_vm11, %v2151_v49 }
 0x784   :  { %1994 = vmatpush.msk.msrb.mxu1 %vm1588_vm10, %v2151_v49 }
 0x785   :  { %v2145_v30 = vpop.eup %2144 }
 0x786   :  { %v1440_v48 = vmul.f32 %v2145_v30, %v1438_v45  ;;  %1995 = vmatpush.msk.msrb.mxu1 %vm1587_vm12, %v2151_v49 }
 0x788   :  { %v1444_v11 = vadd.f32 %v1442_v58, %v1440_v48 }
 0x78a   :  { %v1446_v16 = vmax.f32 %v1444_v11, 0.0 }
 0x78c   :  { %v1447_v10 = vpack.c.bf16 %v1446_v16, %v1445_v15 }
 0x78e   :  { %1967 = vmatmul.msk.bf16.vlgmr.msra.gmra.mxu0 %vm84_vm0, %v1447_v10 }
 0x7ec   :  { %v1652_v32 = vpop.permute.xlu0 %1651 }
 0x7ed   :  { %v1654_v44 = vperm.slane %v1652_v32, 0 }
 0x80b   :  { %v1480_v19 = vpop.f32.mrf.mxu0 }
 0x80c   :  { %v1481_v37 = vadd.f32 %v2062_v54, %v1480_v19 }
 0x80e   :  { %v1485_v23 = vmax.f32 %v1481_v37, 0.0 }
 0x813   :  { %v1482_v5 = vpop.f32.mrf.mxu0 }
 0x814   :  { %v1483_v36 = vadd.f32 %v2062_v54, %v1482_v5 }
 0x816   :  { %v1486_v12 = vmax.f32 %v1483_v36, 0.0 }
 0x818   :  { %v1487_v25 = vpack.c.bf16 %v1486_v12, %v1485_v23 }
 0x81a   :  { %1984 = vmatmul.msk.bf16.vlgmr.msra.gmra.mxu1 %vm1524_vm8, %v1487_v25 }
 0x897   :  { %v1537_v52 = vpop.f32.mrf.mxu1 }
 0x898   :  { %v1538_v59 = vadd.f32 %v2063_v26, %v1537_v52 }
 0x89a   :  { %v1542_v33 = vmax.f32 %v1538_v59, 0.0 }
 0x89f   :  { %v1539_v20 = vpop.f32.mrf.mxu1 }
 0x8a0   :  { %v1540_v35 = vadd.f32 %v2063_v26, %v1539_v20 }
 0x8a2   :  { %v1543_v31 = vmax.f32 %v1540_v35, 0.0 }
 0x8a4   :  { %v1544_v7 = vpack.c.bf16 %v1543_v31, %v1542_v33 }
 0x8a6   :  { %v1550_v40 = vsel %vm84_vm0, %v1544_v7, 0 }
 0x8a7   :  { %1559 = vmatpush.bf16.xpose.msra.mxu2 %v1550_v40  ;;  %1576 = vmatpush.bf16.xpose.msra.mxu3 %v1550_v40 }
 0x8ae   :  { %1985 = vmatmul.msk.bf16.vlgmr.msra.gmra.mxu2 %vm84_vm0, %v1545_v41  ;;  %1986 = vmatmul.msk.bf16.vlgmr.msra.gmra.mxu3 %vm84_vm0, %v1565_v42 }
 0x931   :  { %v1561_v47 = vpop.f32.mrf.mxu2  ;;  %v1578_v51 = vpop.f32.mrf.mxu3 }
 0x932   :  { %1993 = vmatmul.msk.f32.vlgmr.msrb.gmra.mxu0 %vm1601_vm13, %v1578_v51  ;;  %1996 = vmatmul.msk.f32.vlgmr.msrb.gmra.mxu1 %vm1601_vm13, %v1561_v47 }
 0x939   :  { %v1563_v53 = vpop.f32.mrf.mxu2  ;;  %v1580_v55 = vpop.f32.mrf.mxu3 }
 0x9af   :  { %v1622_v38 = vpop.f32.mrf.mxu0  ;;  %v1645_v57 = vpop.f32.mrf.mxu1 }
 0x9b0   :  { %v1646_v13 = vadd.f32 %v1645_v57, %v1622_v38 }
 0x9b2   :  { %v1655_v60 = vadd.f32 %v1654_v44, %v1646_v13 }
 0x9b4   :  { %v1997_v61 = vmul.f32 -1.442695, %v1655_v60 }
 0x9b6   :  { %2146 = vpow2.f32 %v1997_v61 }
 0x9bc   :  { %v2147_v0 = vpop.eup %2146 }
 0x9bd   :  { %v1659_v27 = vadd.f32 1.0, %v2147_v0 }
 0x9bf   :  { %2148 = vrcp.f32 %v1659_v27  ;;  %v1671_v2 = vand.u32 2147483648, %v1659_v27  ;;  %v1669_v4 = vand.u32 2147483647, %v1659_v27  ;;  %vm1665_vm14 = vweird.f32 %v1659_v27 }
 0x9c1   :  { %v1672_v24 = vor.u32 1.1754944e-38, %v1671_v2  ;;  %vm1670_vm2 = vcmp.eq.f32.partialorder %v1669_v4, 8.507059e+37 }
 0x9c5   :  { %v2149_v62 = vpop.eup %2148 }
 0x9c6   :  { %v1661_v63 = vmul.f32 %v2149_v62, %v1659_v27  ;;  %vm1666_vm0 = vweird.f32 %v2149_v62 }
 0x9c7   :  { %vm1667_vm15 = vmor %vm1665_vm14, %vm1666_vm0 }
 0x9c8   :  { %v1662_v1 = vsub.f32 1.0, %v1661_v63 }
 0x9ca   :  { %v1663_v3 = vmul.f32 %v2149_v62, %v1662_v1 }
 0x9cc   :  { %v1664_v21 = vadd.f32 %v2149_v62, %v1663_v3 }
 0x9ce   :  { %v1668_v8 = vsel %vm1667_vm15, %v2149_v62, %v1664_v21 }
 0x9cf   :  { %v1673_v34 = vsel %vm1670_vm2, %v1672_v24, %v1668_v8 }
 0x9d0   :  { %1675 = vst [vmem:[%s2881_s17] sm:$0x1] %v1673_v34 }

</bundles_post_ra>
